<compile_context>
chip_gen: v7x
topology: tpu7x:2x2x1
jax: 0.10.0
libtpu: 0.0.40
codegen_flags: <defaults>
</compile_context>

<pallas_src>
import functools
import math

import jax
import jax.numpy as jnp
from jax.experimental import pallas as pl
from jax.experimental.pallas import tpu as pltpu


# -----------------------------------------------------------------------------
# Fused forward kernel: one (batch-tile, decoder-layer) pair per grid step
# -----------------------------------------------------------------------------
def fused_forward_kernel(alphas_ref,                      # SMEM (L, 2)
                         dpos_ref, feat_ref, gmean_ref,   # (R, 2E) (R, F) (R, E)  f32
                         amask_ref, pmask_ref,            # (R, S) (R, Npad)       f32
                         kact_ref,                        # (Bt, Npad, E)          bf16
                         awdp_ref, awdc_ref, awg_ref,     # agent-embedding weights bf16
                         abias_ref,                       # (1, E) summed agent biases f32
                         actwq_ref,                       # (E, E) pointer query weight bf16
                         kc_ref, vc_ref,                  # (1, Bt, S, E) per-layer caches bf16
                         wq_ref, wo_ref, fw1_ref, fb1_ref, fw2_ref,   # per-layer weights
                         dvec_ref,                        # (1, 7, E) packed per-layer vectors f32
                         logits_ref, ae_ref,              # outputs (R, Npad) (R, E)
                         x_scr, ctx_scr,                  # VMEM scratch (R, E) f32
                         *, num_heads, b_tile):
    l = pl.program_id(1)
    n_layers = pl.num_programs(1)
    R, E = x_scr.shape
    Bt = b_tile
    M = R // Bt
    H = num_heads
    Dh = E // H
    scale = 1.0 / math.sqrt(Dh)
    NEG = -1e9                      # finite sentinel for softmax masking (avoids inf-inf NaN)
    f32 = jnp.float32
    bf16 = jnp.bfloat16

    # ---- AgentEmbedding (first layer step of each batch tile only) ----------------------
    @pl.when(l == 0)
    def _agent_embedding():
        x0 = jnp.dot(dpos_ref[...].astype(bf16), awdp_ref[...], preferred_element_type=f32)
        x0 = x0 + jnp.dot(feat_ref[...].astype(bf16), awdc_ref[...], preferred_element_type=f32)
        x0 = x0 + jnp.dot(gmean_ref[...].astype(bf16), awg_ref[...], preferred_element_type=f32)
        x_scr[...] = x0 + abias_ref[...]

    # ---- CrossAttentionCacheKVLayer (layer index = grid axis 1) -------------------------
    x2 = x_scr[...]                                        # (R, E) f32, carried across layers
    vecs = dvec_ref[0]                                     # (7, E): bq,bo,ln1g,ln1b,fb2,ln2g,ln2b
    q2 = jnp.dot(x2.astype(bf16), wq_ref[0], preferred_element_type=f32) + vecs[0:1]
    amask = amask_ref[...]                                 # (R, S), 1.0 == masked

    # per-batch-element multi-head attention over cached K/V (static small loops; per-head
    # context is written into a VMEM scratch lane-slice instead of list+concat)
    for b in range(Bt):
        rows = slice(b * M, (b + 1) * M)
        kc_b = kc_ref[0, b]                                # (S, E) bf16
        vc_b = vc_ref[0, b]                                # (S, E) bf16
        q_b = q2[rows]                                     # (M, E) f32
        m_b = amask[rows]                                  # (M, S)
        for h in range(H):
            sl = slice(h * Dh, (h + 1) * Dh)
            s = jax.lax.dot_general(q_b[:, sl].astype(bf16), kc_b[:, sl],
                                    (((1,), (1,)), ((), ())),
                                    preferred_element_type=f32) * scale
            s = jnp.where(m_b > 0.5, NEG, s)
            mx = jnp.max(s, axis=-1, keepdims=True)
            e = jnp.exp(s - mx)
            p = e * pl.reciprocal(jnp.sum(e, axis=-1, keepdims=True), approx=True)
            ctx_scr[rows, sl] = jnp.dot(p.astype(bf16), vc_b[:, sl],
                                        preferred_element_type=f32)

    att = jnp.dot(ctx_scr[...].astype(bf16), wo_ref[0], preferred_element_type=f32) + vecs[1:2]

    a1 = alphas_ref[l, 0]
    a2 = alphas_ref[l, 1]

    # residual + LayerNorm1
    hidden = a1 * att + x2
    mu1 = jnp.mean(hidden, axis=-1, keepdims=True)
    var1 = jnp.mean((hidden - mu1) ** 2, axis=-1, keepdims=True)
    h_ln = (hidden - mu1) * jax.lax.rsqrt(var1 + 1e-5) * vecs[2:3] + vecs[3:4]

    # FFN (Linear -> GELU -> Linear)
    # TODO(synk): PyTorch nn.GELU() is exact erf; tanh approximation used for TPU lowering.
    f = jnp.dot(h_ln.astype(bf16), fw1_ref[0], preferred_element_type=f32) + fb1_ref[0]
    f = jax.nn.gelu(f)
    f = jnp.dot(f.astype(bf16), fw2_ref[0], preferred_element_type=f32) + vecs[4:5]

    # residual + LayerNorm2
    out = a2 * f + h_ln
    mu2 = jnp.mean(out, axis=-1, keepdims=True)
    var2 = jnp.mean((out - mu2) ** 2, axis=-1, keepdims=True)
    out = (out - mu2) * jax.lax.rsqrt(var2 + 1e-5) * vecs[5:6] + vecs[6:7]

    # ActionDecoder comm mixing: first E//4 lanes replaced by max over agents (lane-index select)
    qtr = E // 4
    lane = jax.lax.broadcasted_iota(jnp.int32, (M, E), 1)
    for b in range(Bt):
        rows = slice(b * M, (b + 1) * M)
        out_b = out[rows]
        comm = jnp.max(out_b, axis=0, keepdims=True)       # (1, E)
        x_scr[rows, :] = jnp.where(lane < qtr, jnp.broadcast_to(comm, (M, E)), out_b)

    # ---- SingleHeadAttentionCacheK pointer head (last layer only) -----------------------
    # TODO(synk): class body not given; standard AM pointer head (no bias, clip=10) assumed.
    @pl.when(l == n_layers - 1)
    def _pointer_head():
        xf = x_scr[...]                                    # (R, E) f32
        ae_ref[...] = xf
        qp = jnp.dot(xf.astype(bf16), actwq_ref[...], preferred_element_type=f32)
        inv = 1.0 / math.sqrt(E)
        for b in range(Bt):
            rows = slice(b * M, (b + 1) * M)
            u = jax.lax.dot_general(qp[rows].astype(bf16), kact_ref[b],
                                    (((1,), (1,)), ((), ())),
                                    preferred_element_type=f32) * inv
            u = 10.0 * jnp.tanh(u)
            logits_ref[rows, :] = jnp.where(pmask_ref[rows] > 0.5, -jnp.inf, u)


# -----------------------------------------------------------------------------
# Batch-tile picker: largest divisor of B (<= cap) whose row block is sublane aligned,
# preferring >= 2 grid steps so both v7x TensorCores get work; falls back to the full batch
# in one step (block == full array, always layout-legal).
# -----------------------------------------------------------------------------
def _pick_b_tile(batch, n_agents, cap=16):
    best = batch
    for t in range(1, min(cap, batch) + 1):
        if batch % t != 0 or t == batch:
            continue
        if (t * n_agents) % 8 != 0:
            continue
        if batch // t >= 2:
            best = t
    return best


def _round_up(n, m):
    return ((n + m - 1) // m) * m


# -----------------------------------------------------------------------------
# Pallas wrapper (single fused pallas_call over grid = (batch_tiles, layers))
# -----------------------------------------------------------------------------
def fused_forward_pallas(params, depot_pos, graph_mean, feats, attn_mask, ptr_mask,
                         kc, vc, k_action, num_heads):
    B, M, E2 = depot_pos.shape
    E = E2 // 2
    F = feats.shape[-1]
    S = attn_mask.shape[-1]
    Npad = ptr_mask.shape[-1]
    L = kc.shape[0]
    dec = params['dec']
    Hd = dec['fw1'].shape[-1]
    bf16 = jnp.bfloat16

    Bt = _pick_b_tile(B, M)
    n_bt = B // Bt
    R = Bt * M
    BM = B * M

    # Flatten per-agent-row activations so the kernel sees plain 2-D (rows, feature) blocks
    # (no in-kernel reshapes); graph mean is pre-broadcast to rows (tiny, one row per agent).
    dpos2 = depot_pos.reshape(BM, 2 * E)
    feats2 = feats.reshape(BM, F)
    gmean2 = jnp.broadcast_to(graph_mean, (B, M, E)).reshape(BM, E)
    amask2 = attn_mask.reshape(BM, S)
    pmask2 = ptr_mask.reshape(BM, Npad)

    # Matmul operands in bf16; biases / LN params / masks stay f32.
    aw_dp = params['aw_dp'].astype(bf16)
    aw_dc = params['aw_dc'].astype(bf16)
    aw_g = params['aw_g'].astype(bf16)
    act_wq = params['act_wq'].astype(bf16)
    wq = dec['wq'].astype(bf16)
    wo = dec['wo'].astype(bf16)
    fw1 = dec['fw1'].astype(bf16)
    fw2 = dec['fw2'].astype(bf16)
    a_bias = params['ab_dp'] + params['ab_dc'] + params['ab_g']          # (1, E)
    dvec = jnp.concatenate([dec['bq'], dec['bo'], dec['ln1_g'], dec['ln1_b'],
                            dec['fb2'], dec['ln2_g'], dec['ln2_b']], axis=1)   # (L, 7, E)
    fb1 = dec['fb1']                                                     # (L, 1, Hd)

    smem = pl.BlockSpec(memory_space=pltpu.MemorySpace.SMEM)

    def rows_spec(cols):
        return pl.BlockSpec((R, cols), lambda bt, l: (bt, 0))

    def const_spec(*shape):
        nz = (0,) * len(shape)
        return pl.BlockSpec(shape, lambda bt, l: nz)

    def layer_spec(*tail):
        nz = (0,) * len(tail)
        return pl.BlockSpec((1,) + tail, lambda bt, l: (l,) + nz)

    kact_spec = pl.BlockSpec((Bt, Npad, E), lambda bt, l: (bt, 0, 0))
    kv_spec = lambda: pl.BlockSpec((1, Bt, S, E), lambda bt, l: (l, bt, 0, 0))

    in_specs = [
        smem,                                                            # alphas
        rows_spec(2 * E), rows_spec(F), rows_spec(E),                    # dpos, feats, gmean
        rows_spec(S), rows_spec(Npad),                                   # attn mask, pointer mask
        kact_spec,                                                       # pointer keys
        const_spec(2 * E, E), const_spec(F, E), const_spec(E, E),        # agent-embed weights
        const_spec(1, E), const_spec(E, E),                              # a_bias, act_wq
        kv_spec(), kv_spec(),                                            # per-layer K/V caches
        layer_spec(E, E), layer_spec(E, E),                              # wq, wo
        layer_spec(E, Hd), layer_spec(1, Hd), layer_spec(Hd, E),         # fw1, fb1, fw2
        layer_spec(7, E),                                                # packed bias/LN vectors
    ]
    out_specs = (pl.BlockSpec((R, Npad), lambda bt, l: (bt, 0)),
                 pl.BlockSpec((R, E), lambda bt, l: (bt, 0)))
    out_shape = (jax.ShapeDtypeStruct((BM, Npad), jnp.float32),
                 jax.ShapeDtypeStruct((BM, E), jnp.float32))

    kernel = functools.partial(fused_forward_kernel, num_heads=num_heads, b_tile=Bt)
    logits2, ae2 = pl.pallas_call(
        kernel,
        out_shape=out_shape,
        grid=(n_bt, L),
        in_specs=in_specs,
        out_specs=out_specs,
        scratch_shapes=[pltpu.VMEM((R, E), jnp.float32),    # activation carry across layers
                        pltpu.VMEM((R, E), jnp.float32)],   # per-head context assembly
        compiler_params=pltpu.CompilerParams(
            dimension_semantics=("parallel", "arbitrary"),
            vmem_limit_bytes=32 * 1024 * 1024),
    )(dec['alphas'],
      dpos2, feats2, gmean2, amask2, pmask2, k_action,
      aw_dp, aw_dc, aw_g, a_bias, act_wq,
      kc, vc,
      wq, wo, fw1, fb1, fw2, dvec)

    return logits2.reshape(B, M, Npad), ae2.reshape(B, M, E)


# -----------------------------------------------------------------------------
# Plain-JAX glue: parameters, CityEncoder (init_city) and decoder KV caches (setup path)
# -----------------------------------------------------------------------------
def init_params(key, *, embed_dim, enc_hidden, dec_hidden,
                num_enc_layers, num_dec_layers, agent_feat_dim):
    keys = iter(jax.random.split(key, 64))

    def w(shape, scale=0.1):
        return scale * jax.random.normal(next(keys), shape, dtype=jnp.float32)

    E = embed_dim
    L = num_dec_layers
    p = {
        # CityEmbedding / CityEncoder
        'ce_depot_w': w((2, E)), 'ce_depot_b': jnp.zeros((E,), jnp.float32),
        'ce_city_w': w((2, E)), 'ce_city_b': jnp.zeros((E,), jnp.float32),
        'ce_pos_w': w((E, E)), 'ce_pos_b': jnp.zeros((E,), jnp.float32),
        'ce_alpha': jnp.zeros((1,), jnp.float32),
        'ce_layers': [],
        # AgentEmbedding
        'aw_dp': w((2 * E, E)), 'ab_dp': jnp.zeros((1, E), jnp.float32),
        'aw_dc': w((agent_feat_dim, E)), 'ab_dc': jnp.zeros((1, E), jnp.float32),
        'aw_g': w((E, E)), 'ab_g': jnp.zeros((1, E), jnp.float32),
        # ActionDecoder action head
        'act_wq': w((E, E)), 'act_wk': w((E, E)),
        # ActionDecoder decoder layers, stacked over the layer axis
        'dec': {
            'wq': w((L, E, E)), 'bq': jnp.zeros((L, 1, E), jnp.float32),
            'wk': w((L, E, E)), 'bk': jnp.zeros((L, E), jnp.float32),
            'wv': w((L, E, E)), 'bv': jnp.zeros((L, E), jnp.float32),
            'wo': w((L, E, E)), 'bo': jnp.zeros((L, 1, E), jnp.float32),
            'alphas': jnp.full((L, 2), 0.1, jnp.float32),
            'ln1_g': jnp.ones((L, 1, E), jnp.float32), 'ln1_b': jnp.zeros((L, 1, E), jnp.float32),
            'fw1': w((L, E, dec_hidden)), 'fb1': jnp.zeros((L, 1, dec_hidden), jnp.float32),
            'fw2': w((L, dec_hidden, E)), 'fb2': jnp.zeros((L, 1, E), jnp.float32),
            'ln2_g': jnp.ones((L, 1, E), jnp.float32), 'ln2_b': jnp.zeros((L, 1, E), jnp.float32),
        },
    }
    for _ in range(num_enc_layers):
        p['ce_layers'].append({
            'wq': w((E, E)), 'wk': w((E, E)), 'wv': w((E, E)), 'wo': w((E, E)),
            'bn1_g': jnp.ones((E,), jnp.float32), 'bn1_b': jnp.zeros((E,), jnp.float32),
            'fw1': w((E, enc_hidden)), 'fb1': jnp.zeros((enc_hidden,), jnp.float32),
            'fw2': w((enc_hidden, E)), 'fb2': jnp.zeros((E,), jnp.float32),
            'bn2_g': jnp.ones((E,), jnp.float32), 'bn2_b': jnp.zeros((E,), jnp.float32),
        })
    return p


def positional_encoding(seq_len, d_model):
    pos = jnp.arange(seq_len, dtype=jnp.float32)[:, None]
    div = jnp.exp(jnp.arange(0, d_model, 2, dtype=jnp.float32)
                  * (-math.log(10000.0) / d_model))
    pe = jnp.zeros((seq_len, d_model), jnp.float32)
    pe = pe.at[:, 0::2].set(jnp.sin(pos * div))
    pe = pe.at[:, 1::2].set(jnp.cos(pos * div))
    return pe


def _batch_norm(x, g, b, eps=1e-5):
    flat = x.reshape(-1, x.shape[-1])
    mu = flat.mean(axis=0)
    var = ((flat - mu) ** 2).mean(axis=0)
    return (x - mu) * jax.lax.rsqrt(var + eps) * g + b


def _encoder_layer(x, lp, num_heads):
    B, S, E = x.shape
    Dh = E // num_heads
    q = (x @ lp['wq']).reshape(B, S, num_heads, Dh).transpose(0, 2, 1, 3)
    k = (x @ lp['wk']).reshape(B, S, num_heads, Dh).transpose(0, 2, 1, 3)
    v = (x @ lp['wv']).reshape(B, S, num_heads, Dh).transpose(0, 2, 1, 3)
    s = jnp.einsum('bhqd,bhkd->bhqk', q, k) / math.sqrt(Dh)
    a = jax.nn.softmax(s, axis=-1)
    ctx = jnp.einsum('bhqk,bhkd->bhqd', a, v).transpose(0, 2, 1, 3).reshape(B, S, E)
    h = _batch_norm(x + ctx @ lp['wo'], lp['bn1_g'], lp['bn1_b'])
    f = jax.nn.relu(h @ lp['fw1'] + lp['fb1']) @ lp['fw2'] + lp['fb2']
    return _batch_norm(h + f, lp['bn2_g'], lp['bn2_b'])


def init_city(params, city, n_agents, num_heads):
    """ActionsModel.init_city + ActionDecoder.init (model setup, plain JAX)."""
    B, N, _ = city.shape
    E = params['ce_depot_w'].shape[1]
    depot_embed = city[:, 0:1] @ params['ce_depot_w'] + params['ce_depot_b']
    city_nodes = city[:, 1:] @ params['ce_city_w'] + params['ce_city_b']
    pe = positional_encoding(n_agents + 1, E)
    pos_embed = params['ce_alpha'] * (pe @ params['ce_pos_w'] + params['ce_pos_b'])
    depot_rep = jnp.broadcast_to(depot_embed, (B, n_agents + 1, E))
    depot_pos = depot_rep + pos_embed[None]
    graph = jnp.concatenate([depot_pos[:, 0:1], city_nodes, depot_pos[:, 1:]], axis=1)
    for lp in params['ce_layers']:
        graph = _encoder_layer(graph, lp, num_heads)
    city_embed = graph                                     # (B, N + n_agents, E)
    city_embed_mean = graph.mean(axis=1, keepdims=True)    # (B, 1, E)

    # Cached K/V for each CrossAttentionCacheKVLayer (heads folded into the lane dim), bf16.
    dec = params['dec']
    L = dec['wk'].shape[0]
    kc = jnp.stack([city_embed @ dec['wk'][l] + dec['bk'][l] for l in range(L)]).astype(jnp.bfloat16)
    vc = jnp.stack([city_embed @ dec['wv'][l] + dec['bv'][l] for l in range(L)]).astype(jnp.bfloat16)

    # Cached keys for SingleHeadAttentionCacheK (cities only), lane-padded to a 128 multiple
    # so pointer logits can be stored lane-dense (padded keys are zero -> masked downstream).
    k_cities = city_embed[:, :-n_agents] @ params['act_wk']              # (B, N_city, E)
    n_city = k_cities.shape[1]
    n_pad = _round_up(n_city, 128)
    k_action = jnp.pad(k_cities, ((0, 0), (0, n_pad - n_city), (0, 0))).astype(jnp.bfloat16)
    return city_embed, city_embed_mean, kc, vc, k_action


# -----------------------------------------------------------------------------
# ActionsModel.forward
# -----------------------------------------------------------------------------
def actions_model_forward(params, state, agent, mask, num_heads):
    city_embed, city_embed_mean, kc, vc, k_action = state
    B, M = agent.shape[0], agent.shape[1]
    N = city_embed.shape[1] - M
    Npad = k_action.shape[1]

    cities_embed = city_embed[:, :-M]                      # (B, N, E)
    n_depot_embed = city_embed[:, -M:]                     # (B, M, E)
    agent_idx = agent[:, :, 1].astype(jnp.int32)           # (B, M) current city index
    feats = agent[:, :, 2:]                                # (B, M, 9)

    # Pre-gather current-city rows in plain JAX (clamped gather; removes in-kernel gather/DMA).
    cur_pos = cities_embed[jnp.arange(B)[:, None], agent_idx]            # (B, M, E)
    depot_pos = jnp.concatenate([n_depot_embed, cur_pos], axis=-1)       # (B, M, 2E)

    mask_f = mask.astype(jnp.float32)                      # 1.0 == masked
    extra = jnp.broadcast_to((1.0 - jnp.eye(M, dtype=jnp.float32))[None], (B, M, M))
    expand_masks = jnp.concatenate([mask_f, extra], axis=-1)             # (B, M, N+M)
    ptr_mask = jnp.pad(mask_f, ((0, 0), (0, 0), (0, Npad - N)), constant_values=1.0)

    logits_pad, agent_embed = fused_forward_pallas(
        params, depot_pos, city_embed_mean, feats, expand_masks, ptr_mask,
        kc, vc, k_action, num_heads)

    # TODO(synk): torch isinf/isnan/argwhere/.item() host-side debug introspection skipped
    # (data-dependent, no effect on outputs).
    return logits_pad[:, :, :N], agent_embed


# -----------------------------------------------------------------------------
if __name__ == "__main__":
    B, N_CITY, M = 2, 16, 4          # batch, cities (incl. depot), agents
    E, H = 32, 4                     # embed_dim, num_heads
    ENC_HIDDEN, DEC_HIDDEN = 64, 64
    AGENT_DIM = 11                   # [?, cur_city_idx, 9 distance/cost features]

    root = jax.random.PRNGKey(0)
    kp, kci, ki, kf, km = jax.random.split(root, 5)

    params = init_params(kp, embed_dim=E, enc_hidden=ENC_HIDDEN, dec_hidden=DEC_HIDDEN,
                         num_enc_layers=2, num_dec_layers=2, agent_feat_dim=9)

    city = jax.random.uniform(kci, (B, N_CITY, 2), dtype=jnp.float32)
    state = init_city(params, city, M, num_heads=H)

    agent_pos = jax.random.randint(ki, (B, M), 0, N_CITY)
    agent = jnp.concatenate([
        jnp.zeros((B, M, 1), jnp.float32),
        agent_pos[..., None].astype(jnp.float32),
        jax.random.uniform(kf, (B, M, 9), dtype=jnp.float32)], axis=-1)      # (B, M, 11)

    mask = jax.random.uniform(km, (B, M, N_CITY)) < 0.3                      # True == masked
    mask = mask.at[:, :, 0].set(False)                                       # keep depot open

    logits, agent_embed = actions_model_forward(params, state, agent, mask, num_heads=H)
    jax.block_until_ready((logits, agent_embed))

    assert logits.shape == (B, M, N_CITY)
    assert agent_embed.shape == (B, M, E)
    print("KERNEL_OK")
</pallas_src>

<mosaic_0001>
module attributes {stable_mosaic.version = 11 : i64} {
  func.func @fused_forward_kernel(%arg0: i32, %arg1: i32, %arg2: memref<2x2xf32, #tpu.memory_space<smem>>, %arg3: memref<8x64xf32, #tpu.memory_space<vmem>>, %arg4: memref<8x9xf32, #tpu.memory_space<vmem>>, %arg5: memref<8x32xf32, #tpu.memory_space<vmem>>, %arg6: memref<8x20xf32, #tpu.memory_space<vmem>>, %arg7: memref<8x128xf32, #tpu.memory_space<vmem>>, %arg8: memref<2x128x32xbf16, #tpu.memory_space<vmem>>, %arg9: memref<64x32xbf16, #tpu.memory_space<vmem>>, %arg10: memref<9x32xbf16, #tpu.memory_space<vmem>>, %arg11: memref<32x32xbf16, #tpu.memory_space<vmem>>, %arg12: memref<1x32xf32, #tpu.memory_space<vmem>>, %arg13: memref<32x32xbf16, #tpu.memory_space<vmem>>, %arg14: memref<1x2x20x32xbf16, #tpu.memory_space<vmem>>, %arg15: memref<1x2x20x32xbf16, #tpu.memory_space<vmem>>, %arg16: memref<1x32x32xbf16, #tpu.memory_space<vmem>>, %arg17: memref<1x32x32xbf16, #tpu.memory_space<vmem>>, %arg18: memref<1x32x64xbf16, #tpu.memory_space<vmem>>, %arg19: memref<1x1x64xf32, #tpu.memory_space<vmem>>, %arg20: memref<1x64x32xbf16, #tpu.memory_space<vmem>>, %arg21: memref<1x7x32xf32, #tpu.memory_space<vmem>>, %arg22: memref<8x128xf32, #tpu.memory_space<vmem>>, %arg23: memref<8x32xf32, #tpu.memory_space<vmem>>, %arg24: memref<8x32xf32, #tpu.memory_space<vmem>>, %arg25: memref<8x32xf32, #tpu.memory_space<vmem>>) attributes {dimension_semantics = [#tpu.dimension_semantics<parallel>, #tpu.dimension_semantics<arbitrary>], iteration_bounds = array<i64: 1, 2>, scalar_prefetch = 0 : i64, scratch_operands = 2 : i64, tpu.core_type = #tpu.core_type<tc>, window_params = [{transform_indices = @transform_0, window_bounds = array<i64: 2, 2>}, {transform_indices = @transform_1, window_bounds = array<i64: 8, 64>}, {transform_indices = @transform_2, window_bounds = array<i64: 8, 9>}, {transform_indices = @transform_3, window_bounds = array<i64: 8, 32>}, {transform_indices = @transform_4, window_bounds = array<i64: 8, 20>}, {transform_indices = @transform_5, window_bounds = array<i64: 8, 128>}, {transform_indices = @transform_6, window_bounds = array<i64: 2, 128, 32>}, {pipeline_mode = #tpu.pipeline_mode<synchronous>, transform_indices = @transform_7, window_bounds = array<i64: 64, 32>}, {pipeline_mode = #tpu.pipeline_mode<synchronous>, transform_indices = @transform_8, window_bounds = array<i64: 9, 32>}, {pipeline_mode = #tpu.pipeline_mode<synchronous>, transform_indices = @transform_9, window_bounds = array<i64: 32, 32>}, {pipeline_mode = #tpu.pipeline_mode<synchronous>, transform_indices = @transform_10, window_bounds = array<i64: 1, 32>}, {pipeline_mode = #tpu.pipeline_mode<synchronous>, transform_indices = @transform_11, window_bounds = array<i64: 32, 32>}, {transform_indices = @transform_12, window_bounds = array<i64: 1, 2, 20, 32>}, {transform_indices = @transform_13, window_bounds = array<i64: 1, 2, 20, 32>}, {transform_indices = @transform_14, window_bounds = array<i64: 1, 32, 32>}, {transform_indices = @transform_15, window_bounds = array<i64: 1, 32, 32>}, {transform_indices = @transform_16, window_bounds = array<i64: 1, 32, 64>}, {transform_indices = @transform_17, window_bounds = array<i64: 1, 1, 64>}, {transform_indices = @transform_18, window_bounds = array<i64: 1, 64, 32>}, {transform_indices = @transform_19, window_bounds = array<i64: 1, 7, 32>}, {transform_indices = @transform_20, window_bounds = array<i64: 8, 128>}, {transform_indices = @transform_21, window_bounds = array<i64: 8, 32>}]} {
    %c0_i32 = arith.constant 0 : i32
    %0 = arith.cmpi eq, %arg1, %c0_i32 : i32
    %1 = arith.extui %0 : i1 to i32
    %c0_i32_0 = arith.constant 0 : i32
    %2 = arith.cmpi ne, %1, %c0_i32_0 : i32
    scf.if %2 {
      %c0_134 = arith.constant 0 : index
      %c0_135 = arith.constant 0 : index
      %334 = vector.load %arg3[%c0_134, %c0_135] : memref<8x64xf32, #tpu.memory_space<vmem>>, vector<8x64xf32>
      %335 = arith.truncf %334 : vector<8x64xf32> to vector<8x64xbf16>
      %c0_136 = arith.constant 0 : index
      %c0_137 = arith.constant 0 : index
      %336 = vector.load %arg9[%c0_136, %c0_137] : memref<64x32xbf16, #tpu.memory_space<vmem>>, vector<64x32xbf16>
      %cst_138 = arith.constant dense<0.000000e+00> : vector<8x32xf32>
      %337 = tpu.matmul %335, %336, %cst_138 {dimension_numbers = #tpu.dot_dimension_numbers<[1], [0], [0], [1], [0, 0, 1, 1], [], []>} : vector<8x64xbf16>, vector<64x32xbf16>, vector<8x32xf32> -> vector<8x32xf32>
      %c0_139 = arith.constant 0 : index
      %c0_140 = arith.constant 0 : index
      %338 = vector.load %arg4[%c0_139, %c0_140] : memref<8x9xf32, #tpu.memory_space<vmem>>, vector<8x9xf32>
      %339 = arith.truncf %338 : vector<8x9xf32> to vector<8x9xbf16>
      %c0_141 = arith.constant 0 : index
      %c0_142 = arith.constant 0 : index
      %340 = vector.load %arg10[%c0_141, %c0_142] : memref<9x32xbf16, #tpu.memory_space<vmem>>, vector<9x32xbf16>
      %cst_143 = arith.constant dense<0.000000e+00> : vector<8x32xf32>
      %341 = tpu.matmul %339, %340, %cst_143 {dimension_numbers = #tpu.dot_dimension_numbers<[1], [0], [0], [1], [0, 0, 1, 1], [], []>} : vector<8x9xbf16>, vector<9x32xbf16>, vector<8x32xf32> -> vector<8x32xf32>
      %342 = arith.addf %337, %341 : vector<8x32xf32>
      %c0_144 = arith.constant 0 : index
      %c0_145 = arith.constant 0 : index
      %343 = vector.load %arg5[%c0_144, %c0_145] : memref<8x32xf32, #tpu.memory_space<vmem>>, vector<8x32xf32>
      %344 = arith.truncf %343 : vector<8x32xf32> to vector<8x32xbf16>
      %c0_146 = arith.constant 0 : index
      %c0_147 = arith.constant 0 : index
      %345 = vector.load %arg11[%c0_146, %c0_147] : memref<32x32xbf16, #tpu.memory_space<vmem>>, vector<32x32xbf16>
      %cst_148 = arith.constant dense<0.000000e+00> : vector<8x32xf32>
      %346 = tpu.matmul %344, %345, %cst_148 {dimension_numbers = #tpu.dot_dimension_numbers<[1], [0], [0], [1], [0, 0, 1, 1], [], []>} : vector<8x32xbf16>, vector<32x32xbf16>, vector<8x32xf32> -> vector<8x32xf32>
      %347 = arith.addf %342, %346 : vector<8x32xf32>
      %c0_149 = arith.constant 0 : index
      %c0_150 = arith.constant 0 : index
      %348 = vector.load %arg12[%c0_149, %c0_150] : memref<1x32xf32, #tpu.memory_space<vmem>>, vector<1x32xf32>
      %349 = vector.broadcast %348 : vector<1x32xf32> to vector<8x32xf32>
      %350 = arith.addf %347, %349 : vector<8x32xf32>
      %c0_151 = arith.constant 0 : index
      %c0_152 = arith.constant 0 : index
      %351 = vector.load %arg24[%c0_151, %c0_152] : memref<8x32xf32, #tpu.memory_space<vmem>>, vector<8x32xf32>
      tpu.vector_store %arg24[%c0_151, %c0_152], %350 {strides = array<i32>} : memref<8x32xf32, #tpu.memory_space<vmem>>, vector<8x32xf32>,
    } else {
    }
    %c0 = arith.constant 0 : index
    %c0_1 = arith.constant 0 : index
    %3 = vector.load %arg24[%c0, %c0_1] : memref<8x32xf32, #tpu.memory_space<vmem>>, vector<8x32xf32>
    %c0_2 = arith.constant 0 : index
    %c0_3 = arith.constant 0 : index
    %c0_4 = arith.constant 0 : index
    %4 = vector.load %arg21[%c0_2, %c0_3, %c0_4] : memref<1x7x32xf32, #tpu.memory_space<vmem>>, vector<1x7x32xf32>
    %5 = vector.shape_cast %4 : vector<1x7x32xf32> to vector<7x32xf32>
    %6 = arith.truncf %3 : vector<8x32xf32> to vector<8x32xbf16>
    %c0_5 = arith.constant 0 : index
    %c0_6 = arith.constant 0 : index
    %c0_7 = arith.constant 0 : index
    %7 = vector.load %arg16[%c0_5, %c0_6, %c0_7] : memref<1x32x32xbf16, #tpu.memory_space<vmem>>, vector<1x32x32xbf16>
    %8 = vector.shape_cast %7 : vector<1x32x32xbf16> to vector<32x32xbf16>
    %cst = arith.constant dense<0.000000e+00> : vector<8x32xf32>
    %9 = tpu.matmul %6, %8, %cst {dimension_numbers = #tpu.dot_dimension_numbers<[1], [0], [0], [1], [0, 0, 1, 1], [], []>} : vector<8x32xbf16>, vector<32x32xbf16>, vector<8x32xf32> -> vector<8x32xf32>
    %10 = vector.extract_strided_slice %5 {offsets = [0, 0], sizes = [1, 32], strides = [1, 1]} : vector<7x32xf32> to vector<1x32xf32>
    %11 = vector.broadcast %10 : vector<1x32xf32> to vector<8x32xf32>
    %12 = arith.addf %9, %11 : vector<8x32xf32>
    %c0_8 = arith.constant 0 : index
    %c0_9 = arith.constant 0 : index
    %13 = vector.load %arg6[%c0_8, %c0_9] : memref<8x20xf32, #tpu.memory_space<vmem>>, vector<8x20xf32>
    %c0_10 = arith.constant 0 : index
    %c0_11 = arith.constant 0 : index
    %c0_12 = arith.constant 0 : index
    %c0_13 = arith.constant 0 : index
    %14 = vector.load %arg14[%c0_10, %c0_11, %c0_12, %c0_13] : memref<1x2x20x32xbf16, #tpu.memory_space<vmem>>, vector<1x1x20x32xbf16>
    %15 = vector.shape_cast %14 : vector<1x1x20x32xbf16> to vector<20x32xbf16>
    %c0_14 = arith.constant 0 : index
    %c0_15 = arith.constant 0 : index
    %c0_16 = arith.constant 0 : index
    %c0_17 = arith.constant 0 : index
    %16 = vector.load %arg15[%c0_14, %c0_15, %c0_16, %c0_17] : memref<1x2x20x32xbf16, #tpu.memory_space<vmem>>, vector<1x1x20x32xbf16>
    %17 = vector.shape_cast %16 : vector<1x1x20x32xbf16> to vector<20x32xbf16>
    %18 = vector.extract_strided_slice %12 {offsets = [0, 0], sizes = [4, 32], strides = [1, 1]} : vector<8x32xf32> to vector<4x32xf32>
    %19 = vector.extract_strided_slice %13 {offsets = [0, 0], sizes = [4, 20], strides = [1, 1]} : vector<8x20xf32> to vector<4x20xf32>
    %20 = vector.extract_strided_slice %18 {offsets = [0, 0], sizes = [4, 8], strides = [1, 1]} : vector<4x32xf32> to vector<4x8xf32>
    %21 = arith.truncf %20 : vector<4x8xf32> to vector<4x8xbf16>
    %22 = vector.extract_strided_slice %15 {offsets = [0, 0], sizes = [20, 8], strides = [1, 1]} : vector<20x32xbf16> to vector<20x8xbf16>
    %cst_18 = arith.constant dense<0.000000e+00> : vector<4x20xf32>
    %23 = tpu.matmul %21, %22, %cst_18 {dimension_numbers = #tpu.dot_dimension_numbers<[1], [1], [0], [0], [0, 0, 1, 0], [], []>} : vector<4x8xbf16>, vector<20x8xbf16>, vector<4x20xf32> -> vector<4x20xf32>
    %cst_19 = arith.constant 0.353553385 : f32
    %24 = vector.broadcast %cst_19 : f32 to vector<4x20xf32>
    %25 = arith.mulf %23, %24 : vector<4x20xf32>
    %cst_20 = arith.constant 5.000000e-01 : f32
    %26 = vector.broadcast %cst_20 : f32 to vector<4x20xf32>
    %27 = arith.cmpf ogt, %19, %26 : vector<4x20xf32>
    %cst_21 = arith.constant -1.000000e+09 : f32
    %28 = vector.broadcast %cst_21 : f32 to vector<4x20xf32>
    %29 = arith.select %27, %28, %25 : vector<4x20xi1>, vector<4x20xf32>
    %cst_22 = arith.constant dense<0xFF800000> : vector<4xf32>
    %30 = vector.multi_reduction <maximumf>, %29, %cst_22 [1] : vector<4x20xf32> to vector<4xf32>
    %31 = vector.shape_cast %30 : vector<4xf32> to vector<4x1xf32>
    %32 = vector.broadcast %31 : vector<4x1xf32> to vector<4x20xf32>
    %33 = arith.subf %29, %32 : vector<4x20xf32>
    %34 = math.exp %33 : vector<4x20xf32>
    %cst_23 = arith.constant dense<0.000000e+00> : vector<4xf32>
    %35 = vector.multi_reduction <add>, %34, %cst_23 [1] : vector<4x20xf32> to vector<4xf32>
    %36 = vector.shape_cast %35 : vector<4xf32> to vector<4x1xf32>
    %37 = tpu.reciprocal %36 {approx = true} : vector<4x1xf32> -> vector<4x1xf32>
    %38 = vector.broadcast %37 : vector<4x1xf32> to vector<4x20xf32>
    %39 = arith.mulf %34, %38 : vector<4x20xf32>
    %40 = arith.truncf %39 : vector<4x20xf32> to vector<4x20xbf16>
    %41 = vector.extract_strided_slice %17 {offsets = [0, 0], sizes = [20, 8], strides = [1, 1]} : vector<20x32xbf16> to vector<20x8xbf16>
    %cst_24 = arith.constant dense<0.000000e+00> : vector<4x8xf32>
    %42 = tpu.matmul %40, %41, %cst_24 {dimension_numbers = #tpu.dot_dimension_numbers<[1], [0], [0], [1], [0, 0, 1, 1], [], []>} : vector<4x20xbf16>, vector<20x8xbf16>, vector<4x8xf32> -> vector<4x8xf32>
    %c0_25 = arith.constant 0 : index
    %c0_26 = arith.constant 0 : index
    %43 = vector.load %arg25[%c0_25, %c0_26] : memref<8x32xf32, #tpu.memory_space<vmem>>, vector<4x8xf32>
    tpu.vector_store %arg25[%c0_25, %c0_26], %42 {strides = array<i32>} : memref<8x32xf32, #tpu.memory_space<vmem>>, vector<4x8xf32>,
    %44 = vector.extract_strided_slice %18 {offsets = [0, 8], sizes = [4, 8], strides = [1, 1]} : vector<4x32xf32> to vector<4x8xf32>
    %45 = arith.truncf %44 : vector<4x8xf32> to vector<4x8xbf16>
    %46 = vector.extract_strided_slice %15 {offsets = [0, 8], sizes = [20, 8], strides = [1, 1]} : vector<20x32xbf16> to vector<20x8xbf16>
    %cst_27 = arith.constant dense<0.000000e+00> : vector<4x20xf32>
    %47 = tpu.matmul %45, %46, %cst_27 {dimension_numbers = #tpu.dot_dimension_numbers<[1], [1], [0], [0], [0, 0, 1, 0], [], []>} : vector<4x8xbf16>, vector<20x8xbf16>, vector<4x20xf32> -> vector<4x20xf32>
    %cst_28 = arith.constant 0.353553385 : f32
    %48 = vector.broadcast %cst_28 : f32 to vector<4x20xf32>
    %49 = arith.mulf %47, %48 : vector<4x20xf32>
    %cst_29 = arith.constant 5.000000e-01 : f32
    %50 = vector.broadcast %cst_29 : f32 to vector<4x20xf32>
    %51 = arith.cmpf ogt, %19, %50 : vector<4x20xf32>
    %cst_30 = arith.constant -1.000000e+09 : f32
    %52 = vector.broadcast %cst_30 : f32 to vector<4x20xf32>
    %53 = arith.select %51, %52, %49 : vector<4x20xi1>, vector<4x20xf32>
    %cst_31 = arith.constant dense<0xFF800000> : vector<4xf32>
    %54 = vector.multi_reduction <maximumf>, %53, %cst_31 [1] : vector<4x20xf32> to vector<4xf32>
    %55 = vector.shape_cast %54 : vector<4xf32> to vector<4x1xf32>
    %56 = vector.broadcast %55 : vector<4x1xf32> to vector<4x20xf32>
    %57 = arith.subf %53, %56 : vector<4x20xf32>
    %58 = math.exp %57 : vector<4x20xf32>
    %cst_32 = arith.constant dense<0.000000e+00> : vector<4xf32>
    %59 = vector.multi_reduction <add>, %58, %cst_32 [1] : vector<4x20xf32> to vector<4xf32>
    %60 = vector.shape_cast %59 : vector<4xf32> to vector<4x1xf32>
    %61 = tpu.reciprocal %60 {approx = true} : vector<4x1xf32> -> vector<4x1xf32>
    %62 = vector.broadcast %61 : vector<4x1xf32> to vector<4x20xf32>
    %63 = arith.mulf %58, %62 : vector<4x20xf32>
    %64 = arith.truncf %63 : vector<4x20xf32> to vector<4x20xbf16>
    %65 = vector.extract_strided_slice %17 {offsets = [0, 8], sizes = [20, 8], strides = [1, 1]} : vector<20x32xbf16> to vector<20x8xbf16>
    %cst_33 = arith.constant dense<0.000000e+00> : vector<4x8xf32>
    %66 = tpu.matmul %64, %65, %cst_33 {dimension_numbers = #tpu.dot_dimension_numbers<[1], [0], [0], [1], [0, 0, 1, 1], [], []>} : vector<4x20xbf16>, vector<20x8xbf16>, vector<4x8xf32> -> vector<4x8xf32>
    %c0_34 = arith.constant 0 : index
    %c8 = arith.constant 8 : index
    %67 = vector.load %arg25[%c0_34, %c8] : memref<8x32xf32, #tpu.memory_space<vmem>>, vector<4x8xf32>
    tpu.vector_store %arg25[%c0_34, %c8], %66 {strides = array<i32>} : memref<8x32xf32, #tpu.memory_space<vmem>>, vector<4x8xf32>,
    %68 = vector.extract_strided_slice %18 {offsets = [0, 16], sizes = [4, 8], strides = [1, 1]} : vector<4x32xf32> to vector<4x8xf32>
    %69 = arith.truncf %68 : vector<4x8xf32> to vector<4x8xbf16>
    %70 = vector.extract_strided_slice %15 {offsets = [0, 16], sizes = [20, 8], strides = [1, 1]} : vector<20x32xbf16> to vector<20x8xbf16>
    %cst_35 = arith.constant dense<0.000000e+00> : vector<4x20xf32>
    %71 = tpu.matmul %69, %70, %cst_35 {dimension_numbers = #tpu.dot_dimension_numbers<[1], [1], [0], [0], [0, 0, 1, 0], [], []>} : vector<4x8xbf16>, vector<20x8xbf16>, vector<4x20xf32> -> vector<4x20xf32>
    %cst_36 = arith.constant 0.353553385 : f32
    %72 = vector.broadcast %cst_36 : f32 to vector<4x20xf32>
    %73 = arith.mulf %71, %72 : vector<4x20xf32>
    %cst_37 = arith.constant 5.000000e-01 : f32
    %74 = vector.broadcast %cst_37 : f32 to vector<4x20xf32>
    %75 = arith.cmpf ogt, %19, %74 : vector<4x20xf32>
    %cst_38 = arith.constant -1.000000e+09 : f32
    %76 = vector.broadcast %cst_38 : f32 to vector<4x20xf32>
    %77 = arith.select %75, %76, %73 : vector<4x20xi1>, vector<4x20xf32>
    %cst_39 = arith.constant dense<0xFF800000> : vector<4xf32>
    %78 = vector.multi_reduction <maximumf>, %77, %cst_39 [1] : vector<4x20xf32> to vector<4xf32>
    %79 = vector.shape_cast %78 : vector<4xf32> to vector<4x1xf32>
    %80 = vector.broadcast %79 : vector<4x1xf32> to vector<4x20xf32>
    %81 = arith.subf %77, %80 : vector<4x20xf32>
    %82 = math.exp %81 : vector<4x20xf32>
    %cst_40 = arith.constant dense<0.000000e+00> : vector<4xf32>
    %83 = vector.multi_reduction <add>, %82, %cst_40 [1] : vector<4x20xf32> to vector<4xf32>
    %84 = vector.shape_cast %83 : vector<4xf32> to vector<4x1xf32>
    %85 = tpu.reciprocal %84 {approx = true} : vector<4x1xf32> -> vector<4x1xf32>
    %86 = vector.broadcast %85 : vector<4x1xf32> to vector<4x20xf32>
    %87 = arith.mulf %82, %86 : vector<4x20xf32>
    %88 = arith.truncf %87 : vector<4x20xf32> to vector<4x20xbf16>
    %89 = vector.extract_strided_slice %17 {offsets = [0, 16], sizes = [20, 8], strides = [1, 1]} : vector<20x32xbf16> to vector<20x8xbf16>
    %cst_41 = arith.constant dense<0.000000e+00> : vector<4x8xf32>
    %90 = tpu.matmul %88, %89, %cst_41 {dimension_numbers = #tpu.dot_dimension_numbers<[1], [0], [0], [1], [0, 0, 1, 1], [], []>} : vector<4x20xbf16>, vector<20x8xbf16>, vector<4x8xf32> -> vector<4x8xf32>
    %c0_42 = arith.constant 0 : index
    %c16 = arith.constant 16 : index
    %91 = vector.load %arg25[%c0_42, %c16] : memref<8x32xf32, #tpu.memory_space<vmem>>, vector<4x8xf32>
    tpu.vector_store %arg25[%c0_42, %c16], %90 {strides = array<i32>} : memref<8x32xf32, #tpu.memory_space<vmem>>, vector<4x8xf32>,
    %92 = vector.extract_strided_slice %18 {offsets = [0, 24], sizes = [4, 8], strides = [1, 1]} : vector<4x32xf32> to vector<4x8xf32>
    %93 = arith.truncf %92 : vector<4x8xf32> to vector<4x8xbf16>
    %94 = vector.extract_strided_slice %15 {offsets = [0, 24], sizes = [20, 8], strides = [1, 1]} : vector<20x32xbf16> to vector<20x8xbf16>
    %cst_43 = arith.constant dense<0.000000e+00> : vector<4x20xf32>
    %95 = tpu.matmul %93, %94, %cst_43 {dimension_numbers = #tpu.dot_dimension_numbers<[1], [1], [0], [0], [0, 0, 1, 0], [], []>} : vector<4x8xbf16>, vector<20x8xbf16>, vector<4x20xf32> -> vector<4x20xf32>
    %cst_44 = arith.constant 0.353553385 : f32
    %96 = vector.broadcast %cst_44 : f32 to vector<4x20xf32>
    %97 = arith.mulf %95, %96 : vector<4x20xf32>
    %cst_45 = arith.constant 5.000000e-01 : f32
    %98 = vector.broadcast %cst_45 : f32 to vector<4x20xf32>
    %99 = arith.cmpf ogt, %19, %98 : vector<4x20xf32>
    %cst_46 = arith.constant -1.000000e+09 : f32
    %100 = vector.broadcast %cst_46 : f32 to vector<4x20xf32>
    %101 = arith.select %99, %100, %97 : vector<4x20xi1>, vector<4x20xf32>
    %cst_47 = arith.constant dense<0xFF800000> : vector<4xf32>
    %102 = vector.multi_reduction <maximumf>, %101, %cst_47 [1] : vector<4x20xf32> to vector<4xf32>
    %103 = vector.shape_cast %102 : vector<4xf32> to vector<4x1xf32>
    %104 = vector.broadcast %103 : vector<4x1xf32> to vector<4x20xf32>
    %105 = arith.subf %101, %104 : vector<4x20xf32>
    %106 = math.exp %105 : vector<4x20xf32>
    %cst_48 = arith.constant dense<0.000000e+00> : vector<4xf32>
    %107 = vector.multi_reduction <add>, %106, %cst_48 [1] : vector<4x20xf32> to vector<4xf32>
    %108 = vector.shape_cast %107 : vector<4xf32> to vector<4x1xf32>
    %109 = tpu.reciprocal %108 {approx = true} : vector<4x1xf32> -> vector<4x1xf32>
    %110 = vector.broadcast %109 : vector<4x1xf32> to vector<4x20xf32>
    %111 = arith.mulf %106, %110 : vector<4x20xf32>
    %112 = arith.truncf %111 : vector<4x20xf32> to vector<4x20xbf16>
    %113 = vector.extract_strided_slice %17 {offsets = [0, 24], sizes = [20, 8], strides = [1, 1]} : vector<20x32xbf16> to vector<20x8xbf16>
    %cst_49 = arith.constant dense<0.000000e+00> : vector<4x8xf32>
    %114 = tpu.matmul %112, %113, %cst_49 {dimension_numbers = #tpu.dot_dimension_numbers<[1], [0], [0], [1], [0, 0, 1, 1], [], []>} : vector<4x20xbf16>, vector<20x8xbf16>, vector<4x8xf32> -> vector<4x8xf32>
    %c0_50 = arith.constant 0 : index
    %c24 = arith.constant 24 : index
    %115 = vector.load %arg25[%c0_50, %c24] : memref<8x32xf32, #tpu.memory_space<vmem>>, vector<4x8xf32>
    tpu.vector_store %arg25[%c0_50, %c24], %114 {strides = array<i32>} : memref<8x32xf32, #tpu.memory_space<vmem>>, vector<4x8xf32>,
    %c0_51 = arith.constant 0 : index
    %c1 = arith.constant 1 : index
    %c0_52 = arith.constant 0 : index
    %c0_53 = arith.constant 0 : index
    %116 = vector.load %arg14[%c0_51, %c1, %c0_52, %c0_53] : memref<1x2x20x32xbf16, #tpu.memory_space<vmem>>, vector<1x1x20x32xbf16>
    %117 = vector.shape_cast %116 : vector<1x1x20x32xbf16> to vector<20x32xbf16>
    %c0_54 = arith.constant 0 : index
    %c1_55 = arith.constant 1 : index
    %c0_56 = arith.constant 0 : index
    %c0_57 = arith.constant 0 : index
    %118 = vector.load %arg15[%c0_54, %c1_55, %c0_56, %c0_57] : memref<1x2x20x32xbf16, #tpu.memory_space<vmem>>, vector<1x1x20x32xbf16>
    %119 = vector.shape_cast %118 : vector<1x1x20x32xbf16> to vector<20x32xbf16>
    %120 = vector.extract_strided_slice %12 {offsets = [4, 0], sizes = [4, 32], strides = [1, 1]} : vector<8x32xf32> to vector<4x32xf32>
    %121 = vector.extract_strided_slice %13 {offsets = [4, 0], sizes = [4, 20], strides = [1, 1]} : vector<8x20xf32> to vector<4x20xf32>
    %122 = vector.extract_strided_slice %120 {offsets = [0, 0], sizes = [4, 8], strides = [1, 1]} : vector<4x32xf32> to vector<4x8xf32>
    %123 = arith.truncf %122 : vector<4x8xf32> to vector<4x8xbf16>
    %124 = vector.extract_strided_slice %117 {offsets = [0, 0], sizes = [20, 8], strides = [1, 1]} : vector<20x32xbf16> to vector<20x8xbf16>
    %cst_58 = arith.constant dense<0.000000e+00> : vector<4x20xf32>
    %125 = tpu.matmul %123, %124, %cst_58 {dimension_numbers = #tpu.dot_dimension_numbers<[1], [1], [0], [0], [0, 0, 1, 0], [], []>} : vector<4x8xbf16>, vector<20x8xbf16>, vector<4x20xf32> -> vector<4x20xf32>
    %cst_59 = arith.constant 0.353553385 : f32
    %126 = vector.broadcast %cst_59 : f32 to vector<4x20xf32>
    %127 = arith.mulf %125, %126 : vector<4x20xf32>
    %cst_60 = arith.constant 5.000000e-01 : f32
    %128 = vector.broadcast %cst_60 : f32 to vector<4x20xf32>
    %129 = arith.cmpf ogt, %121, %128 : vector<4x20xf32>
    %cst_61 = arith.constant -1.000000e+09 : f32
    %130 = vector.broadcast %cst_61 : f32 to vector<4x20xf32>
    %131 = arith.select %129, %130, %127 : vector<4x20xi1>, vector<4x20xf32>
    %cst_62 = arith.constant dense<0xFF800000> : vector<4xf32>
    %132 = vector.multi_reduction <maximumf>, %131, %cst_62 [1] : vector<4x20xf32> to vector<4xf32>
    %133 = vector.shape_cast %132 : vector<4xf32> to vector<4x1xf32>
    %134 = vector.broadcast %133 : vector<4x1xf32> to vector<4x20xf32>
    %135 = arith.subf %131, %134 : vector<4x20xf32>
    %136 = math.exp %135 : vector<4x20xf32>
    %cst_63 = arith.constant dense<0.000000e+00> : vector<4xf32>
    %137 = vector.multi_reduction <add>, %136, %cst_63 [1] : vector<4x20xf32> to vector<4xf32>
    %138 = vector.shape_cast %137 : vector<4xf32> to vector<4x1xf32>
    %139 = tpu.reciprocal %138 {approx = true} : vector<4x1xf32> -> vector<4x1xf32>
    %140 = vector.broadcast %139 : vector<4x1xf32> to vector<4x20xf32>
    %141 = arith.mulf %136, %140 : vector<4x20xf32>
    %142 = arith.truncf %141 : vector<4x20xf32> to vector<4x20xbf16>
    %143 = vector.extract_strided_slice %119 {offsets = [0, 0], sizes = [20, 8], strides = [1, 1]} : vector<20x32xbf16> to vector<20x8xbf16>
    %cst_64 = arith.constant dense<0.000000e+00> : vector<4x8xf32>
    %144 = tpu.matmul %142, %143, %cst_64 {dimension_numbers = #tpu.dot_dimension_numbers<[1], [0], [0], [1], [0, 0, 1, 1], [], []>} : vector<4x20xbf16>, vector<20x8xbf16>, vector<4x8xf32> -> vector<4x8xf32>
    %c4 = arith.constant 4 : index
    %c0_65 = arith.constant 0 : index
    %145 = vector.load %arg25[%c4, %c0_65] : memref<8x32xf32, #tpu.memory_space<vmem>>, vector<4x8xf32>
    tpu.vector_store %arg25[%c4, %c0_65], %144 {strides = array<i32>} : memref<8x32xf32, #tpu.memory_space<vmem>>, vector<4x8xf32>,
    %146 = vector.extract_strided_slice %120 {offsets = [0, 8], sizes = [4, 8], strides = [1, 1]} : vector<4x32xf32> to vector<4x8xf32>
    %147 = arith.truncf %146 : vector<4x8xf32> to vector<4x8xbf16>
    %148 = vector.extract_strided_slice %117 {offsets = [0, 8], sizes = [20, 8], strides = [1, 1]} : vector<20x32xbf16> to vector<20x8xbf16>
    %cst_66 = arith.constant dense<0.000000e+00> : vector<4x20xf32>
    %149 = tpu.matmul %147, %148, %cst_66 {dimension_numbers = #tpu.dot_dimension_numbers<[1], [1], [0], [0], [0, 0, 1, 0], [], []>} : vector<4x8xbf16>, vector<20x8xbf16>, vector<4x20xf32> -> vector<4x20xf32>
    %cst_67 = arith.constant 0.353553385 : f32
    %150 = vector.broadcast %cst_67 : f32 to vector<4x20xf32>
    %151 = arith.mulf %149, %150 : vector<4x20xf32>
    %cst_68 = arith.constant 5.000000e-01 : f32
    %152 = vector.broadcast %cst_68 : f32 to vector<4x20xf32>
    %153 = arith.cmpf ogt, %121, %152 : vector<4x20xf32>
    %cst_69 = arith.constant -1.000000e+09 : f32
    %154 = vector.broadcast %cst_69 : f32 to vector<4x20xf32>
    %155 = arith.select %153, %154, %151 : vector<4x20xi1>, vector<4x20xf32>
    %cst_70 = arith.constant dense<0xFF800000> : vector<4xf32>
    %156 = vector.multi_reduction <maximumf>, %155, %cst_70 [1] : vector<4x20xf32> to vector<4xf32>
    %157 = vector.shape_cast %156 : vector<4xf32> to vector<4x1xf32>
    %158 = vector.broadcast %157 : vector<4x1xf32> to vector<4x20xf32>
    %159 = arith.subf %155, %158 : vector<4x20xf32>
    %160 = math.exp %159 : vector<4x20xf32>
    %cst_71 = arith.constant dense<0.000000e+00> : vector<4xf32>
    %161 = vector.multi_reduction <add>, %160, %cst_71 [1] : vector<4x20xf32> to vector<4xf32>
    %162 = vector.shape_cast %161 : vector<4xf32> to vector<4x1xf32>
    %163 = tpu.reciprocal %162 {approx = true} : vector<4x1xf32> -> vector<4x1xf32>
    %164 = vector.broadcast %163 : vector<4x1xf32> to vector<4x20xf32>
    %165 = arith.mulf %160, %164 : vector<4x20xf32>
    %166 = arith.truncf %165 : vector<4x20xf32> to vector<4x20xbf16>
    %167 = vector.extract_strided_slice %119 {offsets = [0, 8], sizes = [20, 8], strides = [1, 1]} : vector<20x32xbf16> to vector<20x8xbf16>
    %cst_72 = arith.constant dense<0.000000e+00> : vector<4x8xf32>
    %168 = tpu.matmul %166, %167, %cst_72 {dimension_numbers = #tpu.dot_dimension_numbers<[1], [0], [0], [1], [0, 0, 1, 1], [], []>} : vector<4x20xbf16>, vector<20x8xbf16>, vector<4x8xf32> -> vector<4x8xf32>
    %c4_73 = arith.constant 4 : index
    %c8_74 = arith.constant 8 : index
    %169 = vector.load %arg25[%c4_73, %c8_74] : memref<8x32xf32, #tpu.memory_space<vmem>>, vector<4x8xf32>
    tpu.vector_store %arg25[%c4_73, %c8_74], %168 {strides = array<i32>} : memref<8x32xf32, #tpu.memory_space<vmem>>, vector<4x8xf32>,
    %170 = vector.extract_strided_slice %120 {offsets = [0, 16], sizes = [4, 8], strides = [1, 1]} : vector<4x32xf32> to vector<4x8xf32>
    %171 = arith.truncf %170 : vector<4x8xf32> to vector<4x8xbf16>
    %172 = vector.extract_strided_slice %117 {offsets = [0, 16], sizes = [20, 8], strides = [1, 1]} : vector<20x32xbf16> to vector<20x8xbf16>
    %cst_75 = arith.constant dense<0.000000e+00> : vector<4x20xf32>
    %173 = tpu.matmul %171, %172, %cst_75 {dimension_numbers = #tpu.dot_dimension_numbers<[1], [1], [0], [0], [0, 0, 1, 0], [], []>} : vector<4x8xbf16>, vector<20x8xbf16>, vector<4x20xf32> -> vector<4x20xf32>
    %cst_76 = arith.constant 0.353553385 : f32
    %174 = vector.broadcast %cst_76 : f32 to vector<4x20xf32>
    %175 = arith.mulf %173, %174 : vector<4x20xf32>
    %cst_77 = arith.constant 5.000000e-01 : f32
    %176 = vector.broadcast %cst_77 : f32 to vector<4x20xf32>
    %177 = arith.cmpf ogt, %121, %176 : vector<4x20xf32>
    %cst_78 = arith.constant -1.000000e+09 : f32
    %178 = vector.broadcast %cst_78 : f32 to vector<4x20xf32>
    %179 = arith.select %177, %178, %175 : vector<4x20xi1>, vector<4x20xf32>
    %cst_79 = arith.constant dense<0xFF800000> : vector<4xf32>
    %180 = vector.multi_reduction <maximumf>, %179, %cst_79 [1] : vector<4x20xf32> to vector<4xf32>
    %181 = vector.shape_cast %180 : vector<4xf32> to vector<4x1xf32>
    %182 = vector.broadcast %181 : vector<4x1xf32> to vector<4x20xf32>
    %183 = arith.subf %179, %182 : vector<4x20xf32>
    %184 = math.exp %183 : vector<4x20xf32>
    %cst_80 = arith.constant dense<0.000000e+00> : vector<4xf32>
    %185 = vector.multi_reduction <add>, %184, %cst_80 [1] : vector<4x20xf32> to vector<4xf32>
    %186 = vector.shape_cast %185 : vector<4xf32> to vector<4x1xf32>
    %187 = tpu.reciprocal %186 {approx = true} : vector<4x1xf32> -> vector<4x1xf32>
    %188 = vector.broadcast %187 : vector<4x1xf32> to vector<4x20xf32>
    %189 = arith.mulf %184, %188 : vector<4x20xf32>
    %190 = arith.truncf %189 : vector<4x20xf32> to vector<4x20xbf16>
    %191 = vector.extract_strided_slice %119 {offsets = [0, 16], sizes = [20, 8], strides = [1, 1]} : vector<20x32xbf16> to vector<20x8xbf16>
    %cst_81 = arith.constant dense<0.000000e+00> : vector<4x8xf32>
    %192 = tpu.matmul %190, %191, %cst_81 {dimension_numbers = #tpu.dot_dimension_numbers<[1], [0], [0], [1], [0, 0, 1, 1], [], []>} : vector<4x20xbf16>, vector<20x8xbf16>, vector<4x8xf32> -> vector<4x8xf32>
    %c4_82 = arith.constant 4 : index
    %c16_83 = arith.constant 16 : index
    %193 = vector.load %arg25[%c4_82, %c16_83] : memref<8x32xf32, #tpu.memory_space<vmem>>, vector<4x8xf32>
    tpu.vector_store %arg25[%c4_82, %c16_83], %192 {strides = array<i32>} : memref<8x32xf32, #tpu.memory_space<vmem>>, vector<4x8xf32>,
    %194 = vector.extract_strided_slice %120 {offsets = [0, 24], sizes = [4, 8], strides = [1, 1]} : vector<4x32xf32> to vector<4x8xf32>
    %195 = arith.truncf %194 : vector<4x8xf32> to vector<4x8xbf16>
    %196 = vector.extract_strided_slice %117 {offsets = [0, 24], sizes = [20, 8], strides = [1, 1]} : vector<20x32xbf16> to vector<20x8xbf16>
    %cst_84 = arith.constant dense<0.000000e+00> : vector<4x20xf32>
    %197 = tpu.matmul %195, %196, %cst_84 {dimension_numbers = #tpu.dot_dimension_numbers<[1], [1], [0], [0], [0, 0, 1, 0], [], []>} : vector<4x8xbf16>, vector<20x8xbf16>, vector<4x20xf32> -> vector<4x20xf32>
    %cst_85 = arith.constant 0.353553385 : f32
    %198 = vector.broadcast %cst_85 : f32 to vector<4x20xf32>
    %199 = arith.mulf %197, %198 : vector<4x20xf32>
    %cst_86 = arith.constant 5.000000e-01 : f32
    %200 = vector.broadcast %cst_86 : f32 to vector<4x20xf32>
    %201 = arith.cmpf ogt, %121, %200 : vector<4x20xf32>
    %cst_87 = arith.constant -1.000000e+09 : f32
    %202 = vector.broadcast %cst_87 : f32 to vector<4x20xf32>
    %203 = arith.select %201, %202, %199 : vector<4x20xi1>, vector<4x20xf32>
    %cst_88 = arith.constant dense<0xFF800000> : vector<4xf32>
    %204 = vector.multi_reduction <maximumf>, %203, %cst_88 [1] : vector<4x20xf32> to vector<4xf32>
    %205 = vector.shape_cast %204 : vector<4xf32> to vector<4x1xf32>
    %206 = vector.broadcast %205 : vector<4x1xf32> to vector<4x20xf32>
    %207 = arith.subf %203, %206 : vector<4x20xf32>
    %208 = math.exp %207 : vector<4x20xf32>
    %cst_89 = arith.constant dense<0.000000e+00> : vector<4xf32>
    %209 = vector.multi_reduction <add>, %208, %cst_89 [1] : vector<4x20xf32> to vector<4xf32>
    %210 = vector.shape_cast %209 : vector<4xf32> to vector<4x1xf32>
    %211 = tpu.reciprocal %210 {approx = true} : vector<4x1xf32> -> vector<4x1xf32>
    %212 = vector.broadcast %211 : vector<4x1xf32> to vector<4x20xf32>
    %213 = arith.mulf %208, %212 : vector<4x20xf32>
    %214 = arith.truncf %213 : vector<4x20xf32> to vector<4x20xbf16>
    %215 = vector.extract_strided_slice %119 {offsets = [0, 24], sizes = [20, 8], strides = [1, 1]} : vector<20x32xbf16> to vector<20x8xbf16>
    %cst_90 = arith.constant dense<0.000000e+00> : vector<4x8xf32>
    %216 = tpu.matmul %214, %215, %cst_90 {dimension_numbers = #tpu.dot_dimension_numbers<[1], [0], [0], [1], [0, 0, 1, 1], [], []>} : vector<4x20xbf16>, vector<20x8xbf16>, vector<4x8xf32> -> vector<4x8xf32>
    %c4_91 = arith.constant 4 : index
    %c24_92 = arith.constant 24 : index
    %217 = vector.load %arg25[%c4_91, %c24_92] : memref<8x32xf32, #tpu.memory_space<vmem>>, vector<4x8xf32>
    tpu.vector_store %arg25[%c4_91, %c24_92], %216 {strides = array<i32>} : memref<8x32xf32, #tpu.memory_space<vmem>>, vector<4x8xf32>,
    %c0_93 = arith.constant 0 : index
    %c0_94 = arith.constant 0 : index
    %218 = vector.load %arg25[%c0_93, %c0_94] : memref<8x32xf32, #tpu.memory_space<vmem>>, vector<8x32xf32>
    %219 = arith.truncf %218 : vector<8x32xf32> to vector<8x32xbf16>
    %c0_95 = arith.constant 0 : index
    %c0_96 = arith.constant 0 : index
    %c0_97 = arith.constant 0 : index
    %220 = vector.load %arg17[%c0_95, %c0_96, %c0_97] : memref<1x32x32xbf16, #tpu.memory_space<vmem>>, vector<1x32x32xbf16>
    %221 = vector.shape_cast %220 : vector<1x32x32xbf16> to vector<32x32xbf16>
    %cst_98 = arith.constant dense<0.000000e+00> : vector<8x32xf32>
    %222 = tpu.matmul %219, %221, %cst_98 {dimension_numbers = #tpu.dot_dimension_numbers<[1], [0], [0], [1], [0, 0, 1, 1], [], []>} : vector<8x32xbf16>, vector<32x32xbf16>, vector<8x32xf32> -> vector<8x32xf32>
    %223 = vector.extract_strided_slice %5 {offsets = [1, 0], sizes = [1, 32], strides = [1, 1]} : vector<7x32xf32> to vector<1x32xf32>
    %224 = vector.broadcast %223 : vector<1x32xf32> to vector<8x32xf32>
    %225 = arith.addf %222, %224 : vector<8x32xf32>
    %226 = arith.index_cast %arg1 : i32 to index
    %c0_99 = arith.constant 0 : index
    %227 = memref.load %arg2[%226, %c0_99] : memref<2x2xf32, #tpu.memory_space<smem>>
    %228 = arith.index_cast %arg1 : i32 to index
    %c1_100 = arith.constant 1 : index
    %229 = memref.load %arg2[%228, %c1_100] : memref<2x2xf32, #tpu.memory_space<smem>>
    %230 = vector.broadcast %227 : f32 to vector<8x32xf32>
    %231 = arith.mulf %230, %225 : vector<8x32xf32>
    %232 = arith.addf %231, %3 : vector<8x32xf32>
    %cst_101 = arith.constant dense<0.000000e+00> : vector<8xf32>
    %233 = vector.multi_reduction <add>, %232, %cst_101 [1] : vector<8x32xf32> to vector<8xf32>
    %234 = vector.shape_cast %233 : vector<8xf32> to vector<8x1xf32>
    %cst_102 = arith.constant 3.200000e+01 : f32
    %235 = vector.broadcast %cst_102 : f32 to vector<8x1xf32>
    %236 = arith.divf %234, %235 : vector<8x1xf32>
    %237 = vector.broadcast %236 : vector<8x1xf32> to vector<8x32xf32>
    %238 = arith.subf %232, %237 : vector<8x32xf32>
    %239 = arith.mulf %238, %238 : vector<8x32xf32>
    %cst_103 = arith.constant dense<0.000000e+00> : vector<8xf32>
    %240 = vector.multi_reduction <add>, %239, %cst_103 [1] : vector<8x32xf32> to vector<8xf32>
    %241 = vector.shape_cast %240 : vector<8xf32> to vector<8x1xf32>
    %cst_104 = arith.constant 3.200000e+01 : f32
    %242 = vector.broadcast %cst_104 : f32 to vector<8x1xf32>
    %243 = arith.divf %241, %242 : vector<8x1xf32>
    %244 = vector.broadcast %236 : vector<8x1xf32> to vector<8x32xf32>
    %245 = arith.subf %232, %244 : vector<8x32xf32>
    %cst_105 = arith.constant 9.99999974E-6 : f32
    %246 = vector.broadcast %cst_105 : f32 to vector<8x1xf32>
    %247 = arith.addf %243, %246 : vector<8x1xf32>
    %248 = math.rsqrt %247 : vector<8x1xf32>
    %249 = vector.broadcast %248 : vector<8x1xf32> to vector<8x32xf32>
    %250 = arith.mulf %245, %249 : vector<8x32xf32>
    %251 = vector.extract_strided_slice %5 {offsets = [2, 0], sizes = [1, 32], strides = [1, 1]} : vector<7x32xf32> to vector<1x32xf32>
    %252 = vector.broadcast %251 : vector<1x32xf32> to vector<8x32xf32>
    %253 = arith.mulf %250, %252 : vector<8x32xf32>
    %254 = vector.extract_strided_slice %5 {offsets = [3, 0], sizes = [1, 32], strides = [1, 1]} : vector<7x32xf32> to vector<1x32xf32>
    %255 = vector.broadcast %254 : vector<1x32xf32> to vector<8x32xf32>
    %256 = arith.addf %253, %255 : vector<8x32xf32>
    %257 = arith.truncf %256 : vector<8x32xf32> to vector<8x32xbf16>
    %c0_106 = arith.constant 0 : index
    %c0_107 = arith.constant 0 : index
    %c0_108 = arith.constant 0 : index
    %258 = vector.load %arg18[%c0_106, %c0_107, %c0_108] : memref<1x32x64xbf16, #tpu.memory_space<vmem>>, vector<1x32x64xbf16>
    %259 = vector.shape_cast %258 : vector<1x32x64xbf16> to vector<32x64xbf16>
    %cst_109 = arith.constant dense<0.000000e+00> : vector<8x64xf32>
    %260 = tpu.matmul %257, %259, %cst_109 {dimension_numbers = #tpu.dot_dimension_numbers<[1], [0], [0], [1], [0, 0, 1, 1], [], []>} : vector<8x32xbf16>, vector<32x64xbf16>, vector<8x64xf32> -> vector<8x64xf32>
    %c0_110 = arith.constant 0 : index
    %c0_111 = arith.constant 0 : index
    %c0_112 = arith.constant 0 : index
    %261 = vector.load %arg19[%c0_110, %c0_111, %c0_112] : memref<1x1x64xf32, #tpu.memory_space<vmem>>, vector<1x1x64xf32>
    %262 = vector.shape_cast %261 : vector<1x1x64xf32> to vector<1x64xf32>
    %263 = vector.broadcast %262 : vector<1x64xf32> to vector<8x64xf32>
    %264 = arith.addf %260, %263 : vector<8x64xf32>
    %265 = arith.mulf %264, %264 : vector<8x64xf32>
    %266 = arith.mulf %264, %265 : vector<8x64xf32>
    %cst_113 = arith.constant 4.471500e-02 : f32
    %267 = vector.broadcast %cst_113 : f32 to vector<8x64xf32>
    %268 = arith.mulf %267, %266 : vector<8x64xf32>
    %269 = arith.addf %264, %268 : vector<8x64xf32>
    %cst_114 = arith.constant 0.797884583 : f32
    %270 = vector.broadcast %cst_114 : f32 to vector<8x64xf32>
    %271 = arith.mulf %270, %269 : vector<8x64xf32>
    %272 = math.tanh %271 : vector<8x64xf32>
    %cst_115 = arith.constant 1.000000e+00 : f32
    %273 = vector.broadcast %cst_115 : f32 to vector<8x64xf32>
    %274 = arith.addf %273, %272 : vector<8x64xf32>
    %cst_116 = arith.constant 5.000000e-01 : f32
    %275 = vector.broadcast %cst_116 : f32 to vector<8x64xf32>
    %276 = arith.mulf %275, %274 : vector<8x64xf32>
    %277 = arith.mulf %264, %276 : vector<8x64xf32>
    %278 = arith.truncf %277 : vector<8x64xf32> to vector<8x64xbf16>
    %c0_117 = arith.constant 0 : index
    %c0_118 = arith.constant 0 : index
    %c0_119 = arith.constant 0 : index
    %279 = vector.load %arg20[%c0_117, %c0_118, %c0_119] : memref<1x64x32xbf16, #tpu.memory_space<vmem>>, vector<1x64x32xbf16>
    %280 = vector.shape_cast %279 : vector<1x64x32xbf16> to vector<64x32xbf16>
    %cst_120 = arith.constant dense<0.000000e+00> : vector<8x32xf32>
    %281 = tpu.matmul %278, %280, %cst_120 {dimension_numbers = #tpu.dot_dimension_numbers<[1], [0], [0], [1], [0, 0, 1, 1], [], []>} : vector<8x64xbf16>, vector<64x32xbf16>, vector<8x32xf32> -> vector<8x32xf32>
    %282 = vector.extract_strided_slice %5 {offsets = [4, 0], sizes = [1, 32], strides = [1, 1]} : vector<7x32xf32> to vector<1x32xf32>
    %283 = vector.broadcast %282 : vector<1x32xf32> to vector<8x32xf32>
    %284 = arith.addf %281, %283 : vector<8x32xf32>
    %285 = vector.broadcast %229 : f32 to vector<8x32xf32>
    %286 = arith.mulf %285, %284 : vector<8x32xf32>
    %287 = arith.addf %286, %256 : vector<8x32xf32>
    %cst_121 = arith.constant dense<0.000000e+00> : vector<8xf32>
    %288 = vector.multi_reduction <add>, %287, %cst_121 [1] : vector<8x32xf32> to vector<8xf32>
    %289 = vector.shape_cast %288 : vector<8xf32> to vector<8x1xf32>
    %cst_122 = arith.constant 3.200000e+01 : f32
    %290 = vector.broadcast %cst_122 : f32 to vector<8x1xf32>
    %291 = arith.divf %289, %290 : vector<8x1xf32>
    %292 = vector.broadcast %291 : vector<8x1xf32> to vector<8x32xf32>
    %293 = arith.subf %287, %292 : vector<8x32xf32>
    %294 = arith.mulf %293, %293 : vector<8x32xf32>
    %cst_123 = arith.constant dense<0.000000e+00> : vector<8xf32>
    %295 = vector.multi_reduction <add>, %294, %cst_123 [1] : vector<8x32xf32> to vector<8xf32>
    %296 = vector.shape_cast %295 : vector<8xf32> to vector<8x1xf32>
    %cst_124 = arith.constant 3.200000e+01 : f32
    %297 = vector.broadcast %cst_124 : f32 to vector<8x1xf32>
    %298 = arith.divf %296, %297 : vector<8x1xf32>
    %299 = vector.broadcast %291 : vector<8x1xf32> to vector<8x32xf32>
    %300 = arith.subf %287, %299 : vector<8x32xf32>
    %cst_125 = arith.constant 9.99999974E-6 : f32
    %301 = vector.broadcast %cst_125 : f32 to vector<8x1xf32>
    %302 = arith.addf %298, %301 : vector<8x1xf32>
    %303 = math.rsqrt %302 : vector<8x1xf32>
    %304 = vector.broadcast %303 : vector<8x1xf32> to vector<8x32xf32>
    %305 = arith.mulf %300, %304 : vector<8x32xf32>
    %306 = vector.extract_strided_slice %5 {offsets = [5, 0], sizes = [1, 32], strides = [1, 1]} : vector<7x32xf32> to vector<1x32xf32>
    %307 = vector.broadcast %306 : vector<1x32xf32> to vector<8x32xf32>
    %308 = arith.mulf %305, %307 : vector<8x32xf32>
    %309 = vector.extract_strided_slice %5 {offsets = [6, 0], sizes = [1, 32], strides = [1, 1]} : vector<7x32xf32> to vector<1x32xf32>
    %310 = vector.broadcast %309 : vector<1x32xf32> to vector<8x32xf32>
    %311 = arith.addf %308, %310 : vector<8x32xf32>
    %312 = tpu.iota {dimensions = array<i32: 1>} : vector<4x32xi32>
    %313 = vector.extract_strided_slice %311 {offsets = [0, 0], sizes = [4, 32], strides = [1, 1]} : vector<8x32xf32> to vector<4x32xf32>
    %cst_126 = arith.constant dense<0xFF800000> : vector<32xf32>
    %314 = vector.multi_reduction <maximumf>, %313, %cst_126 [0] : vector<4x32xf32> to vector<32xf32>
    %315 = vector.shape_cast %314 : vector<32xf32> to vector<1x32xf32>
    %c8_i32 = arith.constant 8 : i32
    %316 = vector.broadcast %c8_i32 : i32 to vector<4x32xi32>
    %317 = arith.cmpi slt, %312, %316 : vector<4x32xi32>
    %318 = vector.shape_cast %315 : vector<1x32xf32> to vector<1x32xf32>
    %319 = vector.broadcast %318 : vector<1x32xf32> to vector<4x32xf32>
    %320 = arith.select %317, %319, %313 : vector<4x32xi1>, vector<4x32xf32>
    %c0_127 = arith.constant 0 : index
    %c0_128 = arith.constant 0 : index
    %321 = vector.load %arg24[%c0_127, %c0_128] : memref<8x32xf32, #tpu.memory_space<vmem>>, vector<4x32xf32>
    tpu.vector_store %arg24[%c0_127, %c0_128], %320 {strides = array<i32>} : memref<8x32xf32, #tpu.memory_space<vmem>>, vector<4x32xf32>,
    %322 = vector.extract_strided_slice %311 {offsets = [4, 0], sizes = [4, 32], strides = [1, 1]} : vector<8x32xf32> to vector<4x32xf32>
    %cst_129 = arith.constant dense<0xFF800000> : vector<32xf32>
    %323 = vector.multi_reduction <maximumf>, %322, %cst_129 [0] : vector<4x32xf32> to vector<32xf32>
    %324 = vector.shape_cast %323 : vector<32xf32> to vector<1x32xf32>
    %c8_i32_130 = arith.constant 8 : i32
    %325 = vector.broadcast %c8_i32_130 : i32 to vector<4x32xi32>
    %326 = arith.cmpi slt, %312, %325 : vector<4x32xi32>
    %327 = vector.shape_cast %324 : vector<1x32xf32> to vector<1x32xf32>
    %328 = vector.broadcast %327 : vector<1x32xf32> to vector<4x32xf32>
    %329 = arith.select %326, %328, %322 : vector<4x32xi1>, vector<4x32xf32>
    %c4_131 = arith.constant 4 : index
    %c0_132 = arith.constant 0 : index
    %330 = vector.load %arg24[%c4_131, %c0_132] : memref<8x32xf32, #tpu.memory_space<vmem>>, vector<4x32xf32>
    tpu.vector_store %arg24[%c4_131, %c0_132], %329 {strides = array<i32>} : memref<8x32xf32, #tpu.memory_space<vmem>>, vector<4x32xf32>,
    %c1_i32 = arith.constant 1 : i32
    %331 = arith.cmpi eq, %arg1, %c1_i32 : i32
    %332 = arith.extui %331 : i1 to i32
    %c0_i32_133 = arith.constant 0 : i32
    %333 = arith.cmpi ne, %332, %c0_i32_133 : i32
    scf.if %333 {
      %c0_134 = arith.constant 0 : index
      %c0_135 = arith.constant 0 : index
      %334 = vector.load %arg24[%c0_134, %c0_135] : memref<8x32xf32, #tpu.memory_space<vmem>>, vector<8x32xf32>
      %c0_136 = arith.constant 0 : index
      %c0_137 = arith.constant 0 : index
      %335 = vector.load %arg23[%c0_136, %c0_137] : memref<8x32xf32, #tpu.memory_space<vmem>>, vector<8x32xf32>
      tpu.vector_store %arg23[%c0_136, %c0_137], %334 {strides = array<i32>} : memref<8x32xf32, #tpu.memory_space<vmem>>, vector<8x32xf32>,
      %336 = arith.truncf %334 : vector<8x32xf32> to vector<8x32xbf16>
      %c0_138 = arith.constant 0 : index
      %c0_139 = arith.constant 0 : index
      %337 = vector.load %arg13[%c0_138, %c0_139] : memref<32x32xbf16, #tpu.memory_space<vmem>>, vector<32x32xbf16>
      %cst_140 = arith.constant dense<0.000000e+00> : vector<8x32xf32>
      %338 = tpu.matmul %336, %337, %cst_140 {dimension_numbers = #tpu.dot_dimension_numbers<[1], [0], [0], [1], [0, 0, 1, 1], [], []>} : vector<8x32xbf16>, vector<32x32xbf16>, vector<8x32xf32> -> vector<8x32xf32>
      %339 = vector.extract_strided_slice %338 {offsets = [0, 0], sizes = [4, 32], strides = [1, 1]} : vector<8x32xf32> to vector<4x32xf32>
      %340 = arith.truncf %339 : vector<4x32xf32> to vector<4x32xbf16>
      %c0_141 = arith.constant 0 : index
      %c0_142 = arith.constant 0 : index
      %c0_143 = arith.constant 0 : index
      %341 = vector.load %arg8[%c0_141, %c0_142, %c0_143] : memref<2x128x32xbf16, #tpu.memory_space<vmem>>, vector<1x128x32xbf16>
      %342 = vector.shape_cast %341 : vector<1x128x32xbf16> to vector<128x32xbf16>
      %cst_144 = arith.constant dense<0.000000e+00> : vector<4x128xf32>
      %343 = tpu.matmul %340, %342, %cst_144 {dimension_numbers = #tpu.dot_dimension_numbers<[1], [1], [0], [0], [0, 0, 1, 0], [], []>} : vector<4x32xbf16>, vector<128x32xbf16>, vector<4x128xf32> -> vector<4x128xf32>
      %cst_145 = arith.constant 0.176776692 : f32
      %344 = vector.broadcast %cst_145 : f32 to vector<4x128xf32>
      %345 = arith.mulf %343, %344 : vector<4x128xf32>
      %346 = math.tanh %345 : vector<4x128xf32>
      %cst_146 = arith.constant 1.000000e+01 : f32
      %347 = vector.broadcast %cst_146 : f32 to vector<4x128xf32>
      %348 = arith.mulf %347, %346 : vector<4x128xf32>
      %c0_147 = arith.constant 0 : index
      %c0_148 = arith.constant 0 : index
      %349 = vector.load %arg7[%c0_147, %c0_148] : memref<8x128xf32, #tpu.memory_space<vmem>>, vector<4x128xf32>
      %cst_149 = arith.constant 5.000000e-01 : f32
      %350 = vector.broadcast %cst_149 : f32 to vector<4x128xf32>
      %351 = arith.cmpf ogt, %349, %350 : vector<4x128xf32>
      %cst_150 = arith.constant 0xFF800000 : f32
      %352 = vector.broadcast %cst_150 : f32 to vector<4x128xf32>
      %353 = arith.select %351, %352, %348 : vector<4x128xi1>, vector<4x128xf32>
      %c0_151 = arith.constant 0 : index
      %c0_152 = arith.constant 0 : index
      %354 = vector.load %arg22[%c0_151, %c0_152] : memref<8x128xf32, #tpu.memory_space<vmem>>, vector<4x128xf32>
      tpu.vector_store %arg22[%c0_151, %c0_152], %353 {strides = array<i32>} : memref<8x128xf32, #tpu.memory_space<vmem>>, vector<4x128xf32>,
      %355 = vector.extract_strided_slice %338 {offsets = [4, 0], sizes = [4, 32], strides = [1, 1]} : vector<8x32xf32> to vector<4x32xf32>
      %356 = arith.truncf %355 : vector<4x32xf32> to vector<4x32xbf16>
      %c1_153 = arith.constant 1 : index
      %c0_154 = arith.constant 0 : index
      %c0_155 = arith.constant 0 : index
      %357 = vector.load %arg8[%c1_153, %c0_154, %c0_155] : memref<2x128x32xbf16, #tpu.memory_space<vmem>>, vector<1x128x32xbf16>
      %358 = vector.shape_cast %357 : vector<1x128x32xbf16> to vector<128x32xbf16>
      %cst_156 = arith.constant dense<0.000000e+00> : vector<4x128xf32>
      %359 = tpu.matmul %356, %358, %cst_156 {dimension_numbers = #tpu.dot_dimension_numbers<[1], [1], [0], [0], [0, 0, 1, 0], [], []>} : vector<4x32xbf16>, vector<128x32xbf16>, vector<4x128xf32> -> vector<4x128xf32>
      %cst_157 = arith.constant 0.176776692 : f32
      %360 = vector.broadcast %cst_157 : f32 to vector<4x128xf32>
      %361 = arith.mulf %359, %360 : vector<4x128xf32>
      %362 = math.tanh %361 : vector<4x128xf32>
      %cst_158 = arith.constant 1.000000e+01 : f32
      %363 = vector.broadcast %cst_158 : f32 to vector<4x128xf32>
      %364 = arith.mulf %363, %362 : vector<4x128xf32>
      %c4_159 = arith.constant 4 : index
      %c0_160 = arith.constant 0 : index
      %365 = vector.load %arg7[%c4_159, %c0_160] : memref<8x128xf32, #tpu.memory_space<vmem>>, vector<4x128xf32>
      %cst_161 = arith.constant 5.000000e-01 : f32
      %366 = vector.broadcast %cst_161 : f32 to vector<4x128xf32>
      %367 = arith.cmpf ogt, %365, %366 : vector<4x128xf32>
      %cst_162 = arith.constant 0xFF800000 : f32
      %368 = vector.broadcast %cst_162 : f32 to vector<4x128xf32>
      %369 = arith.select %367, %368, %364 : vector<4x128xi1>, vector<4x128xf32>
      %c4_163 = arith.constant 4 : index
      %c0_164 = arith.constant 0 : index
      %370 = vector.load %arg22[%c4_163, %c0_164] : memref<8x128xf32, #tpu.memory_space<vmem>>, vector<4x128xf32>
      tpu.vector_store %arg22[%c4_163, %c0_164], %369 {strides = array<i32>} : memref<8x128xf32, #tpu.memory_space<vmem>>, vector<4x128xf32>,
    } else {
    }
    return
  }
  func.func @transform_0(%arg0: i32, %arg1: i32) -> (i32, i32) {
    %c0_i32 = arith.constant 0 : i32
    %c0_i32_0 = arith.constant 0 : i32
    %c0_i32_1 = arith.constant 0 : i32
    return %c0_i32, %c0_i32_0 : i32, i32
  }
  func.func @transform_1(%arg0: i32, %arg1: i32) -> (i32, i32) {
    %c0_i32 = arith.constant 0 : i32
    %c0_i32_0 = arith.constant 0 : i32
    return %arg0, %c0_i32 : i32, i32
  }
  func.func @transform_2(%arg0: i32, %arg1: i32) -> (i32, i32) {
    %c0_i32 = arith.constant 0 : i32
    %c0_i32_0 = arith.constant 0 : i32
    return %arg0, %c0_i32 : i32, i32
  }
  func.func @transform_3(%arg0: i32, %arg1: i32) -> (i32, i32) {
    %c0_i32 = arith.constant 0 : i32
    %c0_i32_0 = arith.constant 0 : i32
    return %arg0, %c0_i32 : i32, i32
  }
  func.func @transform_4(%arg0: i32, %arg1: i32) -> (i32, i32) {
    %c0_i32 = arith.constant 0 : i32
    %c0_i32_0 = arith.constant 0 : i32
    return %arg0, %c0_i32 : i32, i32
  }
  func.func @transform_5(%arg0: i32, %arg1: i32) -> (i32, i32) {
    %c0_i32 = arith.constant 0 : i32
    %c0_i32_0 = arith.constant 0 : i32
    return %arg0, %c0_i32 : i32, i32
  }
  func.func @transform_6(%arg0: i32, %arg1: i32) -> (i32, i32, i32) {
    %c0_i32 = arith.constant 0 : i32
    %c0_i32_0 = arith.constant 0 : i32
    %c0_i32_1 = arith.constant 0 : i32
    return %arg0, %c0_i32, %c0_i32_0 : i32, i32, i32
  }
  func.func @transform_7(%arg0: i32, %arg1: i32) -> (i32, i32) {
    %c0_i32 = arith.constant 0 : i32
    %c0_i32_0 = arith.constant 0 : i32
    %c0_i32_1 = arith.constant 0 : i32
    return %c0_i32, %c0_i32_0 : i32, i32
  }
  func.func @transform_8(%arg0: i32, %arg1: i32) -> (i32, i32) {
    %c0_i32 = arith.constant 0 : i32
    %c0_i32_0 = arith.constant 0 : i32
    %c0_i32_1 = arith.constant 0 : i32
    return %c0_i32, %c0_i32_0 : i32, i32
  }
  func.func @transform_9(%arg0: i32, %arg1: i32) -> (i32, i32) {
    %c0_i32 = arith.constant 0 : i32
    %c0_i32_0 = arith.constant 0 : i32
    %c0_i32_1 = arith.constant 0 : i32
    return %c0_i32, %c0_i32_0 : i32, i32
  }
  func.func @transform_10(%arg0: i32, %arg1: i32) -> (i32, i32) {
    %c0_i32 = arith.constant 0 : i32
    %c0_i32_0 = arith.constant 0 : i32
    %c0_i32_1 = arith.constant 0 : i32
    return %c0_i32, %c0_i32_0 : i32, i32
  }
  func.func @transform_11(%arg0: i32, %arg1: i32) -> (i32, i32) {
    %c0_i32 = arith.constant 0 : i32
    %c0_i32_0 = arith.constant 0 : i32
    %c0_i32_1 = arith.constant 0 : i32
    return %c0_i32, %c0_i32_0 : i32, i32
  }
  func.func @transform_12(%arg0: i32, %arg1: i32) -> (i32, i32, i32, i32) {
    %c0_i32 = arith.constant 0 : i32
    %c0_i32_0 = arith.constant 0 : i32
    %c0_i32_1 = arith.constant 0 : i32
    return %arg1, %arg0, %c0_i32, %c0_i32_0 : i32, i32, i32, i32
  }
  func.func @transform_13(%arg0: i32, %arg1: i32) -> (i32, i32, i32, i32) {
    %c0_i32 = arith.constant 0 : i32
    %c0_i32_0 = arith.constant 0 : i32
    %c0_i32_1 = arith.constant 0 : i32
    return %arg1, %arg0, %c0_i32, %c0_i32_0 : i32, i32, i32, i32
  }
  func.func @transform_14(%arg0: i32, %arg1: i32) -> (i32, i32, i32) {
    %c0_i32 = arith.constant 0 : i32
    %c0_i32_0 = arith.constant 0 : i32
    %c0_i32_1 = arith.constant 0 : i32
    return %arg1, %c0_i32, %c0_i32_0 : i32, i32, i32
  }
  func.func @transform_15(%arg0: i32, %arg1: i32) -> (i32, i32, i32) {
    %c0_i32 = arith.constant 0 : i32
    %c0_i32_0 = arith.constant 0 : i32
    %c0_i32_1 = arith.constant 0 : i32
    return %arg1, %c0_i32, %c0_i32_0 : i32, i32, i32
  }
  func.func @transform_16(%arg0: i32, %arg1: i32) -> (i32, i32, i32) {
    %c0_i32 = arith.constant 0 : i32
    %c0_i32_0 = arith.constant 0 : i32
    %c0_i32_1 = arith.constant 0 : i32
    return %arg1, %c0_i32, %c0_i32_0 : i32, i32, i32
  }
  func.func @transform_17(%arg0: i32, %arg1: i32) -> (i32, i32, i32) {
    %c0_i32 = arith.constant 0 : i32
    %c0_i32_0 = arith.constant 0 : i32
    %c0_i32_1 = arith.constant 0 : i32
    return %arg1, %c0_i32, %c0_i32_0 : i32, i32, i32
  }
  func.func @transform_18(%arg0: i32, %arg1: i32) -> (i32, i32, i32) {
    %c0_i32 = arith.constant 0 : i32
    %c0_i32_0 = arith.constant 0 : i32
    %c0_i32_1 = arith.constant 0 : i32
    return %arg1, %c0_i32, %c0_i32_0 : i32, i32, i32
  }
  func.func @transform_19(%arg0: i32, %arg1: i32) -> (i32, i32, i32) {
    %c0_i32 = arith.constant 0 : i32
    %c0_i32_0 = arith.constant 0 : i32
    %c0_i32_1 = arith.constant 0 : i32
    return %arg1, %c0_i32, %c0_i32_0 : i32, i32, i32
  }
  func.func @transform_20(%arg0: i32, %arg1: i32) -> (i32, i32) {
    %c0_i32 = arith.constant 0 : i32
    %c0_i32_0 = arith.constant 0 : i32
    return %arg0, %c0_i32 : i32, i32
  }
  func.func @transform_21(%arg0: i32, %arg1: i32) -> (i32, i32) {
    %c0_i32 = arith.constant 0 : i32
    %c0_i32_0 = arith.constant 0 : i32
    return %arg0, %c0_i32 : i32, i32
  }
}

</mosaic_0001>

<bundles_post_ra>
// kernel: tpu_custom_call.1
= control target key start
LH: loop header
LB: loop body
LE: loop exit
PB: predicated region body
PF: predicated region fallthrough
CT: control target
= control target key end

     0   :  { %s4685_s0 = inlined_call_operand.vmem [shape: f32[2,2], index: 0, kind: input, shape index: {}]   ;;  %s4686_s1 = inlined_call_operand.vmem [shape: f32[8,64], index: 1, kind: input, shape index: {}]   ;;  %s4687_s2 = inlined_call_operand.vmem [shape: f32[8,9], index: 2, kind: input, shape index: {}]   ;;  %s4688_s3 = inlined_call_operand.vmem [shape: f32[8,32], index: 3, kind: input, shape index: {}]   ;;  %s4689_s4 = inlined_call_operand.vmem [shape: f32[8,20], index: 4, kind: input, shape index: {}]   ;;  %s4690_s5 = inlined_call_operand.vmem [shape: f32[8,128], index: 5, kind: input, shape index: {}]   ;;  %s4691_s6 = inlined_call_operand.vmem [shape: bf16[2,128,32], index: 6, kind: input, shape index: {}]   ;;  %s4692_s7 = inlined_call_operand.vmem [shape: bf16[64,32], index: 7, kind: input, shape index: {}]   ;;  %s4693_s8 = inlined_call_operand.vmem [shape: bf16[9,32], index: 8, kind: input, shape index: {}]   ;;  %s4694_s9 = inlined_call_operand.vmem [shape: bf16[32,32], index: 9, kind: input, shape index: {}]   ;;  %s4695_s10 = inlined_call_operand.vmem [shape: f32[1,32], index: 10, kind: input, shape index: {}]   ;;  %s4696_s11 = inlined_call_operand.vmem [shape: bf16[32,32], index: 11, kind: input, shape index: {}]   ;;  %s4697_s12 = inlined_call_operand.vmem [shape: bf16[2,2,20,32], index: 12, kind: input, shape index: {}]   ;;  %s4698_s13 = inlined_call_operand.vmem [shape: bf16[2,2,20,32], index: 13, kind: input, shape index: {}]   ;;  %s4699_s14 = inlined_call_operand.vmem [shape: bf16[2,32,32], index: 14, kind: input, shape index: {}]   ;;  %s4700_s15 = inlined_call_operand.vmem [shape: bf16[2,32,32], index: 15, kind: input, shape index: {}]   ;;  %s4701_s16 = inlined_call_operand.vmem [shape: bf16[2,32,64], index: 16, kind: input, shape index: {}]   ;;  %s4702_s17 = inlined_call_operand.vmem [shape: f32[2,1,64], index: 17, kind: input, shape index: {}]   ;;  %s4703_s18 = inlined_call_operand.vmem [shape: bf16[2,64,32], index: 18, kind: input, shape index: {}]   ;;  %s4704_s19 = inlined_call_operand.vmem [shape: f32[2,7,32], index: 19, kind: input, shape index: {}]   ;;  %s4705_s20 = inlined_call_operand.hbm [shape: f32[8,128], index: 20, kind: output, shape index: {0}]   ;;  %s4706_s21 = inlined_call_operand.hbm [shape: f32[8,32], index: 21, kind: output, shape index: {1}]  }
   0x1   :  { %4715 = sst [smem:[#allocation16_spill]] %s4685_s0 }
   0x2   :  { %4716 = sst [smem:[#allocation17_spill]] %s4686_s1 }
   0x3   :  { %4717 = sst [smem:[#allocation18_spill]] %s4687_s2 }
   0x4   :  { %4718 = sst [smem:[#allocation19_spill]] %s4688_s3 }
   0x5   :  { %4719 = sst [smem:[#allocation20_spill]] %s4689_s4 }
   0x6   :  { %4720 = sst [smem:[#allocation21_spill]] %s4690_s5 }
   0x7   :  { %4721 = sst [smem:[#allocation22_spill]] %s4691_s6 }
   0x8   :  { %4722 = sst [smem:[#allocation23_spill]] %s4696_s11 }
   0x9   :  { %4723 = sst [smem:[#allocation24_spill]] %s4697_s12 }
   0xa   :  { %4724 = sst [smem:[#allocation25_spill]] %s4699_s14 }
   0xb   :  { %4725 = sst [smem:[#allocation26_spill]] %s4700_s15 }
   0xc   :  { %4726 = sst [smem:[#allocation27_spill]] %s4705_s20 }
   0xd   :  { %4727 = sst [smem:[#allocation28_spill]] %s4706_s21 }
   0xe   :  { %27 = vsyncpa [#allocation6], 0 }
   0xf   :  { %28 = vsyncpa [#allocation5], 0 }
  0x10   :  { %29 = vsyncpa [#allocation9], 0  ;;  %s4047_s2 = smov 0   ;;  %s4049_s25 = smov 0  }
  0x11   :  { %s4051_s26 = smov 0  }
  0x12 LB: > { %4728 = sst [smem:[#allocation13_spill]] %s3915_s25  ;;  %s4708_s27 = sadd.s32 4294967295, %s3919_s26   ;;  %s3919_s26 = sphi %s4051_s26, %s35_s26   ;;  %s3915_s25 = sphi %s4049_s25, %s4752_s25   ;;  %s3911_s2 = sphi %s4047_s2, %s4751_s2  }
  0x13   : > { %4729 = sst [smem:[#allocation14_spill]] %s3919_s26  ;;  %s44_s3 = sadd.s32 1, %s3915_s25 }
  0x14   : > { %p45_p0 = scmp.ge.s32.totalorder %s44_s3, 2  ;;  %p3210_p1 = scmp.ge.s32.totalorder %s3919_s26, 1 }
  0x15   : > { %p598_p2 = scmp.lt.s32.totalorder %s3919_s26, 3  ;;  %p4074_p4 = scmp.eq.s32.totalorder %s4708_s27, 0 }
  0x16   : > { %s4754_s3 = smov (%p45_p0, %s44_s3), 0  ;;  %s4733_s30 = sld [smem:[#allocation16_spill]] }
  0x17   : > { %4730 = sst [smem:[#allocation15_spill]] %s4754_s3  ;;  %p4068_p3 = pnand %p3210_p1, %p598_p2 }
  0x19   : > { %p3682_p5 = pneg %p4068_p3 }
  0x1b   : > { %p3683_p6 = pnand %p4074_p4, %p3682_p5 }
  0x1c   : > { %s611_s5 = sshll.u32 %s4733_s30, 4  ;;  %s612_s5 = int_to_ptr.vmem [resolvable:$true] %s611_s5 }
  0x1d   : > { %s3818_s22 = scalar_lea.vmem %s612_s5, 32  ;;  %p3820_p8 = pneg %p3683_p6 }
  0x1e   : > { %p3819_p7 = scmp.ne.s32.totalorder %s612_s5, %s3818_s22  ;;  %p3826_p11 = scmp.lt.s32.totalorder %s612_s5, %s612_s5 }
  0x1f   : > { %p3827_p12 = scmp.lt.s32.totalorder %s3818_s22, %s3818_s22 }
  0x20   : > { %p3821_p9 = pnand %p3820_p8, %p3819_p7 }
  0x21   : > { %p3828_p13 = por %p3827_p12, %p3826_p11 }
  0x22   : > { %p3822_p10 = pneg %p3821_p9 }
  0x24   : > { %p3829_p0 = pnand %p3828_p13, %p3822_p10 }
  0x26   : > { %3832 = shalt.err (!%p3829_p0)
}
  0x27   : > { %s3921_s23 = smov [#allocation4]   ;;  %757 = sbr.rel (%p4068_p3) target bundleno = 7072 (0x1ba0), region = 100 }
  0x28   : > { %3685 = dma.vmem_to_smem (!%p3683_p6), %s612_s5, 32, %s3921_s23, [#allocation6]  }
  0x2e   : > { %3898 = dma.done.wait (%p4074_p4), [#allocation6], 32  }
  0x2f   : > { %3900 = vsyncadd (%p4074_p4), [#allocation6], 4294967264 }
  0x30   : > { %763 = sfence }
  0x31   : > { %p909_p1 = scmp.lt.s32.totalorder %s3911_s2, 1  ;;  %s4734_s14 = sld [smem:[#allocation25_spill]] }
  0x32   : > { %s4735_s15 = sld [smem:[#allocation26_spill]]  ;;  %s4736_s12 = sld [smem:[#allocation24_spill]] }
  0x33   : > { %s4093_s1 = scalar_select %p909_p1, %s3911_s2, 1 }
  0x34   : > { %p3232_p2 = scmp.ne.s32.totalorder %s3911_s2, 0 }
  0x35   : > { %s3669_s24 = smul.u32 24, %s4093_s1  ;;  %s3334_s28 = sshll.u32 %s4093_s1, 4  ;;  %v3732_v0 = vld [vmem:[%s4692_s7] sm:$0xff] (!%p3232_p2)   ;;  %v3922_v1 = vmov (!%p3232_p2), 0.0   ;;  %vm985_vm0 = vcmask (!%p3232_p2), 1043456   ;;  %vm986_vm1 = vcmask (!%p3232_p2), 1044480  }
  0x36   : > { %s4120_s0 = scalar_lea.vmem %s4701_s16, %s3334_s28  ;;  %s947_s29 = scalar_lea.vmem %s4702_s17, %s4093_s1  ;;  %3437 = vmatprep.subr.bf16.mxu1 (!%p3232_p2), %v3922_v1  ;;  %3431 = vmatprep.subr.bf16.mxu0 (!%p3232_p2), %v3922_v1  ;;  %v3733_v2 = vld [vmem:[%s4693_s8] sm:$0x1f] (!%p3232_p2)   ;;  %v3734_v3 = vld [vmem:[%s4692_s7 + $0x8] sm:$0xff] (!%p3232_p2)   ;;  %v3923_v4 = vmov (!%p3232_p2), 65535   ;;  %vm3924_vm2 = vmmov (!%p3232_p2), 0   ;;  %v3736_v10 = vld [vmem:[%s4692_s7 + $0x10] sm:$0xff] (!%p3232_p2)  }
  0x37   : > { %s4100_s30 = scalar_lea.vmem %s4734_s14, %s3334_s28  ;;  %s4115_s20 = scalar_lea.vmem %s4698_s13, %s3669_s24  ;;  %3438 = vmatpush3.bf16.msra.mxu1 (!%p3232_p2), %v3732_v0  ;;  %v987_v5 = vsel (!%p3232_p2), %vm985_vm0, 4294967295, %v3923_v4  ;;  %3433 = vmatprep.mubr.msk.bf16.mxu0 (!%p3232_p2), %vm3924_vm2, %v3922_v1  ;;  %vm981_vm3 = vcmask (!%p3232_p2), 72704   ;;  %v3735_v11 = vld [vmem:[%s4694_s9] sm:$0xff] (!%p3232_p2)   ;;  %v3738_v12 = vld [vmem:[%s4692_s7 + $0x18] sm:$0xff] (!%p3232_p2)   ;;  %v3737_v14 = vld [vmem:[%s4694_s9 + $0x8] sm:$0xff] (!%p3232_p2)   ;;  %vm1056_vm4 = vcmask (!%p3232_p2), 523264  }
  0x38   : > { %s4105_s22 = scalar_lea.vmem %s4735_s15, %s3334_s28  ;;  %s4110_s3 = scalar_lea.vmem %s4736_s12, %s3669_s24  ;;  %3439 = vmatprep.subr.bf16.mxu1 (!%p3232_p2), %v3922_v1  ;;  %v988_v7 = vsel (!%p3232_p2), %vm986_vm1, %v987_v5, 0  ;;  %3445 = vmatprep.mubr.msk.bf16.mxu1 (!%p3232_p2), %vm3924_vm2, %v3922_v1  ;;  %vm1118_vm5 = vcmask (!%p3232_p2), 261120   ;;  %v3243_v26 = vld [vmem:[%s4695_s10] ss:$0 sm:$0xff] (!%p3232_p2) }
  0x39   : > { %s3337_s5 = sshll.u32 %s4093_s1, 5  ;;  %s3231_s15 = sshll.u32 %s4093_s1, 3  ;;  %v990_v8 = vand.u32 (!%p3232_p2), %v3733_v2, %v988_v7 }
  0x3a   : > { %s4131_s23 = scalar_lea.vmem %s4703_s18, %s3337_s5  ;;  %s4136_s25 = scalar_lea.vmem %s4704_s19, %s3231_s15 }
  0x3b   : > { %961 = sbr.rel (%p3232_p2) target bundleno = 293 (0x125), region = 108  ;;  %s4737_s4 = sld [smem:[#allocation18_spill]] (!%p3232_p2)  ;;  %3440 = vmatpush3.bf16.msra.mxu1 (!%p3232_p2), %v3734_v3  ;;  %3432 = vmatpush3.bf16.msra.mxu0 (!%p3232_p2), %v990_v8 }
  0x3c   : > { %3441 = vmatprep.subr.bf16.mxu1 (!%p3232_p2), %v3922_v1  ;;  %3449 = vmatprep.subr.bf16.mxu0 (!%p3232_p2), %v3922_v1  ;;  %s4738_s12 = sld [smem:[#allocation17_spill]] (!%p3232_p2)  ;;  %s4739_s27 = sld [smem:[#allocation19_spill]] (!%p3232_p2) }
  0x3f   : > { %3442 = vmatpush3.bf16.msra.mxu1 (!%p3232_p2), %v3736_v10 }
  0x40   : > { %3443 = vmatprep.subr.bf16.mxu1 (!%p3232_p2), %v3922_v1 }
  0x41   : > { %v972_v6 = vld [vmem:[%s4737_s4] sm:$0xff] (!%p3232_p2) }
  0x42   : > { %v973_v9 = vpack.c.bf16 %v972_v6, %v972_v6  ;;  %v962_v13 = vld [vmem:[%s4738_s12] sm:$0xff] }
  0x43   : > { %v1100_v15 = vld [vmem:[%s4739_s27] sm:$0xff]  ;;  %v963_v16 = vpack.c.bf16 %v962_v13, %v962_v13  ;;  %3444 = vmatpush3.bf16.msra.mxu1 %v3738_v12 }
  0x44   : > { %3434 = vmatmul.mubr.msk.bf16.vlgmr.msra.gmra.mrb[0].mxu0 %vm981_vm3, %v973_v9  ;;  %v1101_v17 = vpack.c.bf16 %v1100_v15, %v1100_v15 }
  0x45   : > { %3450 = vmatpush3.bf16.msra.mxu0 %v3735_v11  ;;  %3453 = vmatprep.mubr.msk.bf16.mxu0 %vm3924_vm2, %v3922_v1 }
  0x46   : > { %3451 = vmatprep.subr.bf16.mxu0 %v3922_v1  ;;  %3446 = vmatmul.mubr.msk.bf16.vlgmr.msra.gmra.mrb[0].mxu1 %vm1056_vm4, %v963_v16 }
  0x49   : > { %3452 = vmatpush3.bf16.msra.mxu0 %v3737_v14 }
  0x4c   : > { %3454 = vmatmul.mubr.msk.bf16.vlgmr.msra.gmra.mrb[4].mxu0 %vm1118_vm5, %v1101_v17 }
 0x117   : > { %v1026_v18 = vpop.f32.mrb[0].mxu0 }
 0x118   : > { %v3435_v19 = vpop.f32.mrb[1].mxu0 }
 0x119   : > { %v1029_v20 = vpop.f32.mrb[2].mxu0  ;;  %v1094_v22 = vpop.f32.mrb[0].mxu1 }
 0x11a   : > { %v3436_v21 = vpop.f32.mrb[3].mxu0  ;;  %v1095_v24 = vadd.f32 %v1094_v22, %v1026_v18  ;;  %v3447_v25 = vpop.f32.mrb[1].mxu1 }
 0x11b   : > { %v1097_v28 = vpop.f32.mrb[2].mxu1 }
 0x11c   : > { %v3448_v31 = vpop.f32.mrb[3].mxu1 }
 0x11f   : > { %v1156_v23 = vpop.f32.mrb[4].mxu0 }
 0x120   : > { %v3455_v27 = vpop.f32.mrb[5].mxu0  ;;  %v1162_v29 = vadd.f32 %v1156_v23, %v1095_v24 }
 0x121   : > { %v1159_v30 = vpop.f32.mrb[6].mxu0 }
 0x122   : > { %v3456_v32 = vpop.f32.mrb[7].mxu0  ;;  %v1170_v33 = vadd.f32 %v3243_v26, %v1162_v29 }
 0x124   : > { %1171 = vst.msk [vmem:[#allocation2] sm:$0xff] %vm1118_vm5, %v1170_v33 }
 0x125 PF: > { %v3739_v34 = vld [vmem:[%s4100_s30] sm:$0xff]   ;;  %v3925_v35 = vmov 0.0   ;;  %v3740_v36 = vld [vmem:[%s4100_s30 + $0x8] sm:$0xff]   ;;  %vm3926_vm6 = vmmov 0   ;;  %vm1255_vm7 = vcmask 64512   ;;  %vm1195_vm8 = vcmask 261120  }
 0x126   : > { %3457 = vmatprep.subr.bf16.mxu0 %v3925_v35  ;;  %3465 = vmatprep.subr.bf16.mxu1 %v3925_v35  ;;  %v4187_v38 = vld [vmem:[%s4110_s3] sm:$0xff]   ;;  %v4192_v39 = vld [vmem:[%s4110_s3 + $0x8] ss:$0 sps:$4 sm:$0x33]   ;;  %v1179_v43 = vlaneseq  ;;  %s4740_s14 = sld [smem:[#allocation20_spill]]  ;;  %vm1308_vm10 = vcmask 158720  }
 0x127   : > { %3458 = vmatpush3.bf16.msra.mxu0 %v3739_v34  ;;  %3461 = vmatprep.mubr.msk.bf16.mxu0 %vm3926_vm6, %v3925_v35  ;;  %v1260_v41 = vsel %vm1255_vm7, %v4187_v38, 0  ;;  %v1263_v42 = vsel %vm1255_vm7, %v4192_v39, 0  ;;  %v4211_v46 = vld [vmem:[%s4136_s25] sm:$0x7f]  ;;  %s3927_s24 = smov 120   ;;  %vm1334_vm11 = vcmask 1041408  }
 0x128   : > { %3459 = vmatprep.subr.bf16.mxu0 %v3925_v35  ;;  %3469 = vmatprep.mubr.msk.bf16.mxu1 %vm3926_vm6, %v3925_v35  ;;  %v4207_v44 = vshrl.u32 %v1179_v43, 7  ;;  %v4235_v3 = vld [vmem:[%s4115_s20] sm:$0xff]   ;;  %v4240_v4 = vld [vmem:[%s4115_s20 + $0x8] ss:$0 sps:$4 sm:$0x33]   ;;  %vm1330_vm12 = vcmask 162816  }
 0x129   : > { %3466 = vmatpush3.bf16.xpose.msra.mxu1 %v1260_v41  ;;  %1383 = vrot.lane.b32.xlu1 %v4187_v38, %s3927_s24  ;;  %v1336_v5 = vsel %vm1334_vm11, %v4240_v4, 0  ;;  %vm1378_vm13 = vcmask 60416   ;;  %s3928_s11 = smov 112   ;;  %s3929_s12 = smov 104   ;;  %vm1830_vm14 = vcmask 162820   ;;  %vm1505_vm15 = vcmask 126016  }
 0x12a   : > { %3467 = vmatprep.subr.bf16.mxu1 %v3925_v35  ;;  %v1181_v45 = vsub.s32 0, %v4207_v44  ;;  %s3932_s15 = smov 24   ;;  %vm1631_vm0 = vcmask 191616   ;;  %vm1757_vm1 = vcmask 257216   ;;  %vm2500_vm2 = vcmask 523264   ;;  %p3290_p3 = scmp.ne.s32.totalorder %s3911_s2, 1 }
 0x12b   : > { %v4183_v37 = vld [vmem:[#allocation2] sm:$0xff]  ;;  %3460 = vmatpush3.bf16.msra.mxu0 %v3740_v36  ;;  %vm2572_vm3 = vcmask 257024   ;;  %vm2583_vm4 = vcmask 261124   ;;  %s4741_s5 = sld [smem:[#allocation23_spill]] (!%p3290_p3)  ;;  %s4742_s30 = sld [smem:[#allocation22_spill]] (!%p3290_p3) }
 0x12c   : > { %v1174_v40 = vpack.c.bf16 %v4183_v37, %v4183_v37  ;;  %3473 = vmatprep.subr.bf16.mxu0 %v3925_v35  ;;  %v1182_v47 = vrot.slane %v4211_v46, %v1181_v45  ;;  %v4223_v54 = vld [vmem:[%s4740_s14] sm:$0xff] }
 0x12d   : > { %vm1306_vm9 = vcmp.gt.f32.partialorder %v4223_v54, 0.5  ;;  %1385 = vrot.lane.b32.xlu1 %v4192_v39, %s3927_s24 }
 0x12e   : > { %3462 = vmatmul.mubr.msk.bf16.vlgmr.msra.gmra.mrb[0].mxu0 %vm1195_vm8, %v1174_v40 }
 0x12f   : > { %3477 = vmatprep.mubr.msk.bf16.mxu0 %vm3926_vm6, %v3925_v35  ;;  %3474 = vmatpush3.bf16.msra.mxu0 %v4235_v3 }
 0x130   : > { %3475 = vmatprep.subr.bf16.mxu0 %v3925_v35 }
 0x131   : > { %3468 = vmatpush3.bf16.xpose.msra.mxu1 %v1263_v42 }
 0x132   : > { %3489 = vmatprep.subr.bf16.mxu1 %v3925_v35 }
 0x133   : > { %3476 = vmatpush3.bf16.msra.mxu0 %v1336_v5 }
 0x134   : > { %3481 = vmatprep.subr.bf16.mxu0 %v3925_v35 }
 0x19b   : > { %v1384_v8 = vpop.permute.xlu1 %1383 }
 0x19c   : > { %v1391_v10 = vsel %vm1255_vm7, %v1384_v8, 0 }
 0x19f   : > { %v1386_v12 = vpop.permute.xlu1 %1385 }
 0x1a0   : > { %v1394_v13 = vsel %vm1255_vm7, %v1386_v12, 0 }
 0x201   : > { %v1233_v48 = vpop.f32.mrb[0].mxu0 }
 0x202   : > { %v1234_v49 = vadd.f32 %v1233_v48, %v1182_v47  ;;  %v3463_v50 = vpop.f32.mrb[1].mxu0 }
 0x203   : > { %v1236_v51 = vpop.f32.mrb[2].mxu0 }
 0x204   : > { %v4214_v52 = vpack.c.bf16 %v1234_v49, %v1234_v49  ;;  %v3464_v53 = vpop.f32.mrb[3].mxu0 }
 0x206   : > { %3470 = vmatmul.mubr.msk.bf16.vlgmr.msra.gmra.mrb[0].mxu1 %vm1255_vm7, %v4214_v52 }
 0x207   : > { %3493 = vmatprep.mubr.msk.bf16.mxu1 %vm3926_vm6, %v3925_v35 }
 0x2d9   : > { %v1299_v55 = vpop.f32.mrb[0].mxu1 }
 0x2da   : > { %v1305_v56 = vmul.f32 0.35355338, %v1299_v55  ;;  %v3471_v57 = vpop.f32.mrb[1].mxu1 }
 0x2db   : > { %v1302_v58 = vpop.f32.mrb[2].mxu1 }
 0x2dc   : > { %v3472_v59 = vpop.f32.mrb[3].mxu1  ;;  %v1307_v60 = vsel %vm1306_vm9, -1e+09, %v1305_v56 }
 0x2dd   : > { %v1309_v61 = vsel %vm1308_vm10, %v1307_v60, -inf }
 0x2de   : > { %1310 = vmax.xlane.f32.xlu0 %v1309_v61 }
 0x36b   : > { %v1311_v62 = vpop.xlane.xlu0 %1310 }
 0x36c   : > { %v1312_v63 = vsub.f32 %v1307_v60, %v1311_v62 }
 0x36e   : > { %v1313_v0 = vmul.f32 1.442695, %v1312_v63 }
 0x370   : > { %3757 = vpow2.f32 %v1313_v0 }
 0x37a   : > { %v3758_v1 = vpop.eup %3757 }
 0x37b   : > { %v1315_v2 = vsel %vm1308_vm10, %v3758_v1, 0.0 }
 0x37c   : > { %1316 = vadd.xlane.f32.xlu0 %v1315_v2 }
 0x392   : > { %1381 = vrot.lane.b32.xlu0 %v4214_v52, %s3927_s24 }
 0x409   : > { %v1317_v6 = vpop.xlane.xlu0 %1316 }
 0x40a   : > { %3759 = vrcp.f32 %v1317_v6 }
 0x40d   : > { %v1382_v14 = vpop.permute.xlu0 %1381 }
 0x414   : > { %v3760_v7 = vpop.eup %3759 }
 0x415   : > { %v1319_v9 = vmul.f32 %v3760_v7, %v3758_v1 }
 0x417   : > { %v1320_v11 = vpack.c.bf16 %v1319_v9, %v1319_v9 }
 0x419   : > { %3478 = vmatmul.mubr.msk.bf16.vlgmr.msra.gmra.mrb[4].mxu0 %vm1330_vm12, %v1320_v11 }
 0x41a   : > { %3482 = vmatpush3.bf16.xpose.msra.mxu0 %v1391_v10  ;;  %3485 = vmatprep.mubr.msk.bf16.mxu0 %vm3926_vm6, %v3925_v35 }
 0x41b   : > { %3483 = vmatprep.subr.bf16.mxu0 %v3925_v35 }
 0x422   : > { %3484 = vmatpush3.bf16.xpose.msra.mxu0 %v1394_v13 }
 0x423   : > { %3505 = vmatprep.subr.bf16.mxu0 %v3925_v35 }
 0x429   : > { %3486 = vmatmul.mubr.msk.bf16.vlgmr.msra.gmra.mrb[8].mxu0 %vm1255_vm7, %v1382_v14 }
 0x42a   : > { %3509 = vmatprep.mubr.msk.bf16.mxu0 %vm3926_vm6, %v3925_v35 }
 0x4ec   : > { %v1372_v15 = vpop.f32.mrb[4].mxu0 }
 0x4ed   : > { %1379 = vst.msk [vmem:[#allocation3] sm:$0xf] %vm1378_vm13, %v1372_v15  ;;  %v3479_v16 = vpop.f32.mrb[5].mxu0 }
 0x4ee   : > { %v1375_v17 = vpop.f32.mrb[6].mxu0 }
 0x4ef   : > { %v3480_v18 = vpop.f32.mrb[7].mxu0 }
 0x4fc   : > { %v1430_v19 = vpop.f32.mrb[8].mxu0 }
 0x4fd   : > { %v1436_v20 = vmul.f32 0.35355338, %v1430_v19  ;;  %v3487_v21 = vpop.f32.mrb[9].mxu0 }
 0x4fe   : > { %v1433_v22 = vpop.f32.mrb[10].mxu0 }
 0x4ff   : > { %v3488_v23 = vpop.f32.mrb[11].mxu0  ;;  %v1437_v24 = vsel %vm1306_vm9, -1e+09, %v1436_v20 }
 0x500   : > { %v1438_v25 = vsel %vm1308_vm10, %v1437_v24, -inf }
 0x501   : > { %1439 = vmax.xlane.f32.xlu1 %v1438_v25 }
 0x512   : > { %1450 = vrot.lane.b32.xlu1 %v4235_v3, %s3927_s24 }
 0x516   : > { %1509 = vrot.lane.b32.xlu1 %v4187_v38, %s3928_s11 }
 0x51a   : > { %1511 = vrot.lane.b32.xlu1 %v4192_v39, %s3928_s11 }
 0x51e   : > { %1507 = vrot.lane.b32.xlu1 %v4214_v52, %s3928_s11 }
 0x58e   : > { %v1440_v26 = vpop.xlane.xlu1 %1439 }
 0x58f   : > { %v1441_v27 = vsub.f32 %v1437_v24, %v1440_v26 }
 0x591   : > { %v1442_v28 = vmul.f32 1.442695, %v1441_v27 }
 0x592   : > { %v1451_v29 = vpop.permute.xlu1 %1450 }
 0x593   : > { %3761 = vpow2.f32 %v1442_v28  ;;  %3490 = vmatpush3.bf16.msra.mxu1 %v1451_v29 }
 0x594   : > { %3491 = vmatprep.subr.bf16.mxu1 %v3925_v35 }
 0x596   : > { %v1510_v41 = vpop.permute.xlu1 %1509 }
 0x597   : > { %v1517_v42 = vsel %vm1255_vm7, %v1510_v41, 0 }
 0x59a   : > { %v1512_v47 = vpop.permute.xlu1 %1511 }
 0x59b   : > { %v1520_v48 = vsel %vm1255_vm7, %v1512_v47, 0 }
 0x59d   : > { %v3762_v30 = vpop.eup %3761 }
 0x59e   : > { %v1444_v31 = vsel %vm1308_vm10, %v3762_v30, 0.0  ;;  %v1508_v49 = vpop.permute.xlu1 %1507 }
 0x59f   : > { %1445 = vadd.xlane.f32.xlu0 %v1444_v31 }
 0x5b5   : > { %1452 = vrot.lane.b32.xlu0 %v4240_v4, %s3927_s24 }
 0x62c   : > { %v1446_v32 = vpop.xlane.xlu0 %1445 }
 0x62d   : > { %3763 = vrcp.f32 %v1446_v32 }
 0x630   : > { %v1453_v33 = vpop.permute.xlu0 %1452 }
 0x631   : > { %v1459_v34 = vsel %vm1334_vm11, %v1453_v33, 0 }
 0x632   : > { %3492 = vmatpush3.bf16.msra.mxu1 %v1459_v34 }
 0x633   : > { %3497 = vmatprep.subr.bf16.mxu1 %v3925_v35 }
 0x637   : > { %v3764_v36 = vpop.eup %3763 }
 0x638   : > { %v1448_v40 = vmul.f32 %v3764_v36, %v3762_v30  ;;  %v4328_v36 = vld [vmem:[%s4110_s3 + $0xc] sm:$0xff]  }
 0x63a   : > { %v1449_v45 = vpack.c.bf16 %v1448_v40, %v1448_v40 }
 0x63c   : > { %3494 = vmatmul.mubr.msk.bf16.vlgmr.msra.gmra.mrb[4].mxu1 %vm1330_vm12, %v1449_v45  ;;  %v1780_v45 = vsel %vm1255_vm7, %v4328_v36, 0 }
 0x63d   : > { %3498 = vmatpush3.bf16.xpose.msra.mxu1 %v1517_v42  ;;  %3501 = vmatprep.mubr.msk.bf16.mxu1 %vm3926_vm6, %v3925_v35 }
 0x63e   : > { %3499 = vmatprep.subr.bf16.mxu1 %v3925_v35 }
 0x645   : > { %3500 = vmatpush3.bf16.xpose.msra.mxu1 %v1520_v48  ;;  %v4343_v48 = vrot.slane %v4214_v52, 2 }
 0x646   : > { %3521 = vmatprep.subr.bf16.mxu1 %v3925_v35 }
 0x64c   : > { %3502 = vmatmul.mubr.msk.bf16.vlgmr.msra.gmra.mrb[8].mxu1 %vm1255_vm7, %v1508_v49 }
 0x64d   : > { %3525 = vmatprep.mubr.msk.bf16.mxu1 %vm3926_vm6, %v3925_v35 }
 0x70f   : > { %v4285_v50 = vpop.f32.mrb[4].mxu1 }
 0x710   : > { %v3495_v51 = vpop.f32.mrb[5].mxu1 }
 0x711   : > { %v1498_v53 = vpop.f32.mrb[6].mxu1 }
 0x712   : > { %v3496_v55 = vpop.f32.mrb[7].mxu1 }
 0x71f   : > { %v1556_v56 = vpop.f32.mrb[8].mxu1 }
 0x720   : > { %v1562_v57 = vmul.f32 0.35355338, %v1556_v56  ;;  %v3503_v58 = vpop.f32.mrb[9].mxu1 }
 0x721   : > { %v1559_v59 = vpop.f32.mrb[10].mxu1 }
 0x722   : > { %v3504_v60 = vpop.f32.mrb[11].mxu1  ;;  %v1563_v61 = vsel %vm1306_vm9, -1e+09, %v1562_v57 }
 0x723   : > { %v1564_v62 = vsel %vm1308_vm10, %v1563_v61, -inf }
 0x724   : > { %1565 = vmax.xlane.f32.xlu1 %v1564_v62 }
 0x735   : > { %1576 = vrot.lane.b32.xlu1 %v4235_v3, %s3928_s11 }
 0x739   : > { %1635 = vrot.lane.b32.xlu1 %v4187_v38, %s3929_s12 }
 0x73d   : > { %1637 = vrot.lane.b32.xlu1 %v4192_v39, %s3929_s12 }
 0x741   : > { %1633 = vrot.lane.b32.xlu1 %v4214_v52, %s3929_s12 }
 0x7b1   : > { %v1566_v63 = vpop.xlane.xlu1 %1565 }
 0x7b2   : > { %v1567_v0 = vsub.f32 %v1563_v61, %v1566_v63 }
 0x7b4   : > { %v1568_v1 = vmul.f32 1.442695, %v1567_v0 }
 0x7b5   : > { %v1577_v2 = vpop.permute.xlu1 %1576 }
 0x7b6   : > { %3765 = vpow2.f32 %v1568_v1  ;;  %3506 = vmatpush3.bf16.msra.mxu0 %v1577_v2 }
 0x7b7   : > { %3507 = vmatprep.subr.bf16.mxu0 %v3925_v35 }
 0x7b9   : > { %v1636_v10 = vpop.permute.xlu1 %1635 }
 0x7ba   : > { %v1643_v11 = vsel %vm1255_vm7, %v1636_v10, 0 }
 0x7bd   : > { %v1638_v13 = vpop.permute.xlu1 %1637 }
 0x7be   : > { %v1646_v14 = vsel %vm1255_vm7, %v1638_v13, 0 }
 0x7c0   : > { %v3766_v5 = vpop.eup %3765 }
 0x7c1   : > { %v1570_v6 = vsel %vm1308_vm10, %v3766_v5, 0.0  ;;  %v1634_v15 = vpop.permute.xlu1 %1633 }
 0x7c2   : > { %1571 = vadd.xlane.f32.xlu0 %v1570_v6  ;;  %v4360_v6 = vld [vmem:[%s4115_s20 + $0xc] sm:$0xff]  }
 0x7d8   : > { %1578 = vrot.lane.b32.xlu0 %v4240_v4, %s3928_s11 }
 0x84f   : > { %v1572_v38 = vpop.xlane.xlu0 %1571 }
 0x850   : > { %3767 = vrcp.f32 %v1572_v38  ;;  %v4367_v38 = vld [vmem:[%s4115_s20 + $0x14] ss:$0 sps:$4 sm:$0x33]   ;;  %s3930_s20 = smov 8  }
 0x853   : > { %v1579_v39 = vpop.permute.xlu0 %1578 }
 0x854   : > { %v1585_v7 = vsel %vm1334_vm11, %v1579_v39, 0  ;;  %v1858_v39 = vsel %vm1334_vm11, %v4367_v38, 0 }
 0x855   : > { %3508 = vmatpush3.bf16.msra.mxu0 %v1585_v7 }
 0x856   : > { %3513 = vmatprep.subr.bf16.mxu0 %v3925_v35 }
 0x85a   : > { %v3768_v8 = vpop.eup %3767 }
 0x85b   : > { %v1574_v9 = vmul.f32 %v3768_v8, %v3766_v5 }
 0x85d   : > { %v1575_v12 = vpack.c.bf16 %v1574_v9, %v1574_v9 }
 0x85f   : > { %3510 = vmatmul.mubr.msk.bf16.vlgmr.msra.gmra.mrb[12].mxu0 %vm1330_vm12, %v1575_v12 }
 0x860   : > { %3514 = vmatpush3.bf16.xpose.msra.mxu0 %v1643_v11  ;;  %3517 = vmatprep.mubr.msk.bf16.mxu0 %vm3926_vm6, %v3925_v35 }
 0x861   : > { %3515 = vmatprep.subr.bf16.mxu0 %v3925_v35 }
 0x868   : > { %3516 = vmatpush3.bf16.xpose.msra.mxu0 %v1646_v14 }
 0x869   : > { %3537 = vmatprep.subr.bf16.mxu0 %v3925_v35 }
 0x86f   : > { %3518 = vmatmul.mubr.msk.bf16.vlgmr.msra.gmra.mrb[16].mxu0 %vm1255_vm7, %v1634_v15 }
 0x870   : > { %3541 = vmatprep.mubr.msk.bf16.mxu0 %vm3926_vm6, %v3925_v35  ;;  %3538 = vmatpush3.bf16.msra.mxu0 %v4360_v6 }
 0x871   : > { %3539 = vmatprep.subr.bf16.mxu0 %v3925_v35 }
 0x874   : > { %3540 = vmatpush3.bf16.msra.mxu0 %v1858_v39 }
 0x875   : > { %3545 = vmatprep.subr.bf16.mxu0 %v3925_v35 }
 0x932   : > { %v4314_v16 = vpop.f32.mrb[12].mxu0 }
 0x933   : > { %v3511_v17 = vpop.f32.mrb[13].mxu0 }
 0x934   : > { %v1624_v18 = vpop.f32.mrb[14].mxu0 }
 0x935   : > { %v3512_v19 = vpop.f32.mrb[15].mxu0 }
 0x942   : > { %v1682_v20 = vpop.f32.mrb[16].mxu0 }
 0x943   : > { %v1688_v21 = vmul.f32 0.35355338, %v1682_v20  ;;  %v3519_v22 = vpop.f32.mrb[17].mxu0 }
 0x944   : > { %v1685_v23 = vpop.f32.mrb[18].mxu0 }
 0x945   : > { %v3520_v24 = vpop.f32.mrb[19].mxu0  ;;  %v1689_v25 = vsel %vm1306_vm9, -1e+09, %v1688_v21 }
 0x946   : > { %v1690_v26 = vsel %vm1308_vm10, %v1689_v25, -inf }
 0x947   : > { %1691 = vmax.xlane.f32.xlu0 %v1690_v26 }
 0x95d   : > { %1702 = vrot.lane.b32.xlu0 %v4235_v3, %s3929_s12 }
 0x9d4   : > { %v1692_v27 = vpop.xlane.xlu0 %1691 }
 0x9d5   : > { %v1693_v28 = vsub.f32 %v1689_v25, %v1692_v27 }
 0x9d7   : > { %v1694_v29 = vmul.f32 1.442695, %v1693_v28 }
 0x9d8   : > { %v1703_v32 = vpop.permute.xlu0 %1702 }
 0x9d9   : > { %3769 = vpow2.f32 %v1694_v29  ;;  %3522 = vmatpush3.bf16.msra.mxu1 %v1703_v32 }
 0x9da   : > { %3523 = vmatprep.subr.bf16.mxu1 %v3925_v35 }
 0x9e3   : > { %v3770_v30 = vpop.eup %3769 }
 0x9e4   : > { %v1696_v31 = vsel %vm1308_vm10, %v3770_v30, 0.0 }
 0x9e5   : > { %1697 = vadd.xlane.f32.xlu1 %v1696_v31 }
 0x9f6   : > { %1704 = vrot.lane.b32.xlu1 %v4240_v4, %s3929_s12  ;;  %v4337_v4 = vld [vmem:[%s4110_s3 + $0x14] ss:$0 sps:$4 sm:$0x33]   ;;  %s3931_s3 = smov 16  }
 0x9f7   : > { %v1783_v47 = vsel %vm1255_vm7, %v4337_v4, 0 }
 0xa72   : > { %v1698_v33 = vpop.xlane.xlu1 %1697 }
 0xa73   : > { %3771 = vrcp.f32 %v1698_v33 }
 0xa76   : > { %v1705_v3 = vpop.permute.xlu1 %1704 }
 0xa77   : > { %v1711_v34 = vsel %vm1334_vm11, %v1705_v3, 0 }
 0xa78   : > { %3524 = vmatpush3.bf16.msra.mxu1 %v1711_v34 }
 0xa79   : > { %3529 = vmatprep.subr.bf16.mxu1 %v3925_v35 }
 0xa7d   : > { %v3772_v40 = vpop.eup %3771 }
 0xa7e   : > { %v1700_v41 = vmul.f32 %v3772_v40, %v3770_v30 }
 0xa80   : > { %v1701_v42 = vpack.c.bf16 %v1700_v41, %v1700_v41 }
 0xa82   : > { %3526 = vmatmul.mubr.msk.bf16.vlgmr.msra.gmra.mrb[12].mxu1 %vm1330_vm12, %v1701_v42 }
 0xa83   : > { %3530 = vmatpush3.bf16.xpose.msra.mxu1 %v1780_v45  ;;  %3533 = vmatprep.mubr.msk.bf16.mxu1 %vm3926_vm6, %v3925_v35 }
 0xa84   : > { %3531 = vmatprep.subr.bf16.mxu1 %v3925_v35 }
 0xa8b   : > { %3532 = vmatpush3.bf16.xpose.msra.mxu1 %v1783_v47 }
 0xa8c   : > { %3553 = vmatprep.subr.bf16.mxu1 %v3925_v35 }
 0xa92   : > { %3534 = vmatmul.mubr.msk.bf16.vlgmr.msra.gmra.mrb[16].mxu1 %vm1255_vm7, %v4343_v48 }
 0xa93   : > { %3557 = vmatprep.mubr.msk.bf16.mxu1 %vm3926_vm6, %v3925_v35 }
 0xb55   : > { %v4349_v49 = vpop.f32.mrb[12].mxu1 }
 0xb56   : > { %v3527_v51 = vpop.f32.mrb[13].mxu1 }
 0xb57   : > { %v1750_v53 = vpop.f32.mrb[14].mxu1 }
 0xb58   : > { %v3528_v55 = vpop.f32.mrb[15].mxu1 }
 0xb65   : > { %v1819_v56 = vpop.f32.mrb[16].mxu1 }
 0xb66   : > { %v1825_v57 = vmul.f32 0.35355338, %v1819_v56  ;;  %v3535_v58 = vpop.f32.mrb[17].mxu1 }
 0xb67   : > { %v1822_v59 = vpop.f32.mrb[18].mxu1 }
 0xb68   : > { %v1827_v60 = vrot.slane %v1825_v57, 4  ;;  %v3536_v61 = vpop.f32.mrb[19].mxu1 }
 0xb6a   : > { %v1829_v52 = vsel %vm1306_vm9, -1e+09, %v1827_v60 }
 0xb6b   : > { %v1831_v62 = vsel %vm1830_vm14, %v1829_v52, -inf }
 0xb6c   : > { %1832 = vmax.xlane.f32.xlu0 %v1831_v62 }
 0xb82   : > { %1903 = vrot.lane.b32.xlu0 %v4328_v36, %s3927_s24 }
 0xb86   : > { %1901 = vrot.lane.b32.xlu0 %v4343_v48, %s3927_s24 }
 0xbf9   : > { %v1833_v63 = vpop.xlane.xlu0 %1832 }
 0xbfa   : > { %v1834_v0 = vsub.f32 %v1829_v52, %v1833_v63 }
 0xbfc   : > { %v1835_v1 = vmul.f32 1.442695, %v1834_v0 }
 0xbfd   : > { %v1904_v11 = vpop.permute.xlu0 %1903 }
 0xbfe   : > { %3773 = vpow2.f32 %v1835_v1  ;;  %v1911_v12 = vsel %vm1255_vm7, %v1904_v11, 0 }
 0xc01   : > { %v1902_v17 = vpop.permute.xlu0 %1901 }
 0xc08   : > { %v3774_v2 = vpop.eup %3773 }
 0xc09   : > { %v1837_v5 = vsel %vm1830_vm14, %v3774_v2, 0.0 }
 0xc0a   : > { %1838 = vadd.xlane.f32.xlu1 %v1837_v5 }
 0xc1b   : > { %1905 = vrot.lane.b32.xlu1 %v4337_v4, %s3927_s24 }
 0xc97   : > { %v1839_v7 = vpop.xlane.xlu1 %1838 }
 0xc98   : > { %3775 = vrcp.f32 %v1839_v7 }
 0xc9b   : > { %v1906_v14 = vpop.permute.xlu1 %1905 }
 0xc9c   : > { %v1914_v15 = vsel %vm1255_vm7, %v1906_v14, 0 }
 0xca2   : > { %v3776_v8 = vpop.eup %3775 }
 0xca3   : > { %v1841_v9 = vmul.f32 %v3776_v8, %v3774_v2 }
 0xca5   : > { %v1842_v10 = vpack.c.bf16 %v1841_v9, %v1841_v9 }
 0xca7   : > { %v1844_v13 = vrot.slane %v1842_v10, 2 }
 0xca9   : > { %3542 = vmatmul.mubr.msk.bf16.vlgmr.msra.gmra.mrb[20].mxu0 %vm1330_vm12, %v1844_v13 }
 0xcaa   : > { %3546 = vmatpush3.bf16.xpose.msra.mxu0 %v1911_v12  ;;  %3549 = vmatprep.mubr.msk.bf16.mxu0 %vm3926_vm6, %v3925_v35 }
 0xcab   : > { %3547 = vmatprep.subr.bf16.mxu0 %v3925_v35 }
 0xcb2   : > { %3548 = vmatpush3.bf16.xpose.msra.mxu0 %v1914_v15 }
 0xcb3   : > { %3569 = vmatprep.subr.bf16.mxu0 %v3925_v35 }
 0xcb9   : > { %3550 = vmatmul.mubr.msk.bf16.vlgmr.msra.gmra.mrb[24].mxu0 %vm1255_vm7, %v1902_v17 }
 0xcba   : > { %3573 = vmatprep.mubr.msk.bf16.mxu0 %vm3926_vm6, %v3925_v35 }
 0xd7c   : > { %v1894_v18 = vpop.f32.mrb[20].mxu0 }
 0xd7d   : > { %1900 = vst.msk [vmem:[#allocation3 + $0x4] sm:$0xf] %vm1378_vm13, %v1894_v18  ;;  %v3543_v19 = vpop.f32.mrb[21].mxu0 }
 0xd7e   : > { %v1897_v20 = vpop.f32.mrb[22].mxu0 }
 0xd7f   : > { %v3544_v21 = vpop.f32.mrb[23].mxu0 }
 0xd8c   : > { %v1950_v22 = vpop.f32.mrb[24].mxu0 }
 0xd8d   : > { %v1956_v23 = vmul.f32 0.35355338, %v1950_v22  ;;  %v3551_v24 = vpop.f32.mrb[25].mxu0 }
 0xd8e   : > { %v1953_v25 = vpop.f32.mrb[26].mxu0 }
 0xd8f   : > { %v1958_v26 = vrot.slane %v1956_v23, 4  ;;  %v3552_v27 = vpop.f32.mrb[27].mxu0 }
 0xd91   : > { %v1960_v28 = vsel %vm1306_vm9, -1e+09, %v1958_v26 }
 0xd92   : > { %v1961_v29 = vsel %vm1830_vm14, %v1960_v28, -inf }
 0xd93   : > { %1962 = vmax.xlane.f32.xlu1 %v1961_v29 }
 0xda4   : > { %1977 = vrot.lane.b32.xlu1 %v4367_v38, %s3927_s24 }
 0xda8   : > { %2033 = vrot.lane.b32.xlu1 %v4328_v36, %s3928_s11 }
 0xdac   : > { %2031 = vrot.lane.b32.xlu1 %v4343_v48, %s3928_s11 }
 0xe20   : > { %v1963_v30 = vpop.xlane.xlu1 %1962 }
 0xe21   : > { %v1964_v31 = vsub.f32 %v1960_v28, %v1963_v30 }
 0xe23   : > { %v1965_v32 = vmul.f32 1.442695, %v1964_v31 }
 0xe24   : > { %v1978_v41 = vpop.permute.xlu1 %1977 }
 0xe25   : > { %3777 = vpow2.f32 %v1965_v32  ;;  %v1984_v42 = vsel %vm1334_vm11, %v1978_v41, 0 }
 0xe28   : > { %v2034_v53 = vpop.permute.xlu1 %2033 }
 0xe29   : > { %v2041_v55 = vsel %vm1255_vm7, %v2034_v53, 0 }
 0xe2c   : > { %v2032_v59 = vpop.permute.xlu1 %2031 }
 0xe2f   : > { %v3778_v33 = vpop.eup %3777 }
 0xe30   : > { %v1967_v3 = vsel %vm1830_vm14, %v3778_v33, 0.0 }
 0xe31   : > { %1968 = vadd.xlane.f32.xlu0 %v1967_v3 }
 0xe47   : > { %1975 = vrot.lane.b32.xlu0 %v4360_v6, %s3927_s24 }
 0xe4b   : > { %2035 = vrot.lane.b32.xlu0 %v4337_v4, %s3928_s11 }
 0xebe   : > { %v1969_v34 = vpop.xlane.xlu0 %1968 }
 0xebf   : > { %3779 = vrcp.f32 %v1969_v34 }
 0xec2   : > { %v1976_v40 = vpop.permute.xlu0 %1975 }
 0xec3   : > { %3554 = vmatpush3.bf16.msra.mxu1 %v1976_v40 }
 0xec4   : > { %3555 = vmatprep.subr.bf16.mxu1 %v3925_v35 }
 0xec6   : > { %v2036_v57 = vpop.permute.xlu0 %2035 }
 0xec7   : > { %3556 = vmatpush3.bf16.msra.mxu1 %v1984_v42  ;;  %v2044_v58 = vsel %vm1255_vm7, %v2036_v57, 0 }
 0xec8   : > { %3561 = vmatprep.subr.bf16.mxu1 %v3925_v35 }
 0xec9   : > { %v3780_v45 = vpop.eup %3779 }
 0xeca   : > { %v1971_v47 = vmul.f32 %v3780_v45, %v3778_v33 }
 0xecc   : > { %v1972_v51 = vpack.c.bf16 %v1971_v47, %v1971_v47 }
 0xece   : > { %v1974_v56 = vrot.slane %v1972_v51, 2 }
 0xed0   : > { %3558 = vmatmul.mubr.msk.bf16.vlgmr.msra.gmra.mrb[20].mxu1 %vm1330_vm12, %v1974_v56 }
 0xed1   : > { %3562 = vmatpush3.bf16.xpose.msra.mxu1 %v2041_v55  ;;  %3565 = vmatprep.mubr.msk.bf16.mxu1 %vm3926_vm6, %v3925_v35 }
 0xed2   : > { %3563 = vmatprep.subr.bf16.mxu1 %v3925_v35 }
 0xed9   : > { %3564 = vmatpush3.bf16.xpose.msra.mxu1 %v2044_v58 }
 0xeda   : > { %3585 = vmatprep.subr.bf16.mxu1 %v3925_v35 }
 0xee0   : > { %3566 = vmatmul.mubr.msk.bf16.vlgmr.msra.gmra.mrb[24].mxu1 %vm1255_vm7, %v2032_v59 }
 0xee1   : > { %3589 = vmatprep.mubr.msk.bf16.mxu1 %vm3926_vm6, %v3925_v35 }
 0xfa3   : > { %v4410_v60 = vpop.f32.mrb[20].mxu1 }
 0xfa4   : > { %v3559_v61 = vpop.f32.mrb[21].mxu1 }
 0xfa5   : > { %v2023_v52 = vpop.f32.mrb[22].mxu1  ;;  %v3749_v61 = vld [vmem:[%s4105_s22] sm:$0xff]  }
 0xfa6   : > { %v3560_v62 = vpop.f32.mrb[23].mxu1  ;;  %v3750_v52 = vld [vmem:[%s4105_s22 + $0x8] sm:$0xff]   ;;  %s3280_s22 = sshll.u32 %s3911_s2, 7 }
 0xfa7   : > { %s2357_s28 = sld [smem:[#allocation4 + %s3280_s22]]  ;;  %s2358_s1 = sadd.s32 1, %s3280_s22 }
 0xfb3   : > { %v2080_v63 = vpop.f32.mrb[24].mxu1 }
 0xfb4   : > { %v2086_v0 = vmul.f32 0.35355338, %v2080_v63  ;;  %v3567_v1 = vpop.f32.mrb[25].mxu1 }
 0xfb5   : > { %v2083_v2 = vpop.f32.mrb[26].mxu1 }
 0xfb6   : > { %v2088_v5 = vrot.slane %v2086_v0, 4  ;;  %v3568_v39 = vpop.f32.mrb[27].mxu1 }
 0xfb8   : > { %v2090_v7 = vsel %vm1306_vm9, -1e+09, %v2088_v5 }
 0xfb9   : > { %v2091_v8 = vsel %vm1830_vm14, %v2090_v7, -inf }
 0xfba   : > { %2092 = vmax.xlane.f32.xlu0 %v2091_v8 }
 0xfd0   : > { %2105 = vrot.lane.b32.xlu0 %v4360_v6, %s3928_s11 }
 0xfd4   : > { %2163 = vrot.lane.b32.xlu0 %v4328_v36, %s3929_s12 }
 0xfd8   : > { %2161 = vrot.lane.b32.xlu0 %v4343_v48, %s3929_s12 }
0x1047   : > { %v2093_v9 = vpop.xlane.xlu0 %2092 }
0x1048   : > { %v2094_v10 = vsub.f32 %v2090_v7, %v2093_v9  ;;  %v2299_v7 = vsub.s32 1, %v4207_v44 }
0x104a   : > { %v2095_v11 = vmul.f32 1.442695, %v2094_v10  ;;  %v2300_v8 = vrot.slane %v4211_v46, %v2299_v7  ;;  %v2360_v10 = vstv %s2357_s28 }
0x104b   : > { %v2106_v12 = vpop.permute.xlu0 %2105 }
0x104c   : > { %3781 = vpow2.f32 %v2095_v11  ;;  %3570 = vmatpush3.bf16.msra.mxu0 %v2106_v12 }
0x104d   : > { %3571 = vmatprep.subr.bf16.mxu0 %v3925_v35 }
0x104f   : > { %v2164_v20 = vpop.permute.xlu0 %2163 }
0x1050   : > { %v2171_v21 = vsel %vm1255_vm7, %v2164_v20, 0 }
0x1053   : > { %v2162_v24 = vpop.permute.xlu0 %2161 }
0x1056   : > { %v3782_v13 = vpop.eup %3781 }
0x1057   : > { %v2097_v14 = vsel %vm1830_vm14, %v3782_v13, 0.0 }
0x1058   : > { %2098 = vadd.xlane.f32.xlu1 %v2097_v14 }
0x1069   : > { %2107 = vrot.lane.b32.xlu1 %v4367_v38, %s3928_s11 }
0x106d   : > { %2165 = vrot.lane.b32.xlu1 %v4337_v4, %s3929_s12 }
0x10e5   : > { %v2099_v36 = vpop.xlane.xlu1 %2098 }
0x10e6   : > { %3783 = vrcp.f32 %v2099_v36 }
0x10e9   : > { %v2108_v48 = vpop.permute.xlu1 %2107 }
0x10ea   : > { %v2114_v15 = vsel %vm1334_vm11, %v2108_v48, 0 }
0x10eb   : > { %3572 = vmatpush3.bf16.msra.mxu0 %v2114_v15 }
0x10ec   : > { %3577 = vmatprep.subr.bf16.mxu0 %v3925_v35 }
0x10ed   : > { %v2166_v4 = vpop.permute.xlu1 %2165 }
0x10ee   : > { %v2174_v23 = vsel %vm1255_vm7, %v2166_v4, 0  ;;  %v3752_v4 = vld [vmem:[%s4120_s0 + $0x8] sm:$0xff]  }
0x10f0   : > { %v3784_v17 = vpop.eup %3783 }
0x10f1   : > { %v2101_v18 = vmul.f32 %v3784_v17, %v3782_v13 }
0x10f3   : > { %v2102_v19 = vpack.c.bf16 %v2101_v18, %v2101_v18 }
0x10f5   : > { %v2104_v22 = vrot.slane %v2102_v19, 2 }
0x10f7   : > { %3574 = vmatmul.mubr.msk.bf16.vlgmr.msra.gmra.mrb[28].mxu0 %vm1330_vm12, %v2104_v22  ;;  %v3751_v22 = vld [vmem:[%s4120_s0] sm:$0xff]  }
0x10f8   : > { %3578 = vmatpush3.bf16.xpose.msra.mxu0 %v2171_v21  ;;  %3581 = vmatprep.mubr.msk.bf16.mxu0 %vm3926_vm6, %v3925_v35 }
0x10f9   : > { %3579 = vmatprep.subr.bf16.mxu0 %v3925_v35 }
0x1100   : > { %3580 = vmatpush3.bf16.xpose.msra.mxu0 %v2174_v23 }
0x1101   : > { %3601 = vmatprep.subr.bf16.mxu0 %v3925_v35 }
0x1107   : > { %3582 = vmatmul.mubr.msk.bf16.vlgmr.msra.gmra.mrb[32].mxu0 %vm1255_vm7, %v2162_v24 }
0x1108   : > { %3605 = vmatprep.mubr.msk.bf16.mxu0 %vm3926_vm6, %v3925_v35  ;;  %3602 = vmatpush3.bf16.msra.mxu0 %v3751_v22 }
0x1109   : > { %3603 = vmatprep.subr.bf16.mxu0 %v3925_v35 }
0x110c   : > { %3604 = vmatpush3.bf16.msra.mxu0 %v3752_v4 }
0x11ca   : > { %v2150_v25 = vpop.f32.mrb[28].mxu0 }
0x11cb   : > { %v3575_v26 = vpop.f32.mrb[29].mxu0 }
0x11cc   : > { %v2153_v27 = vpop.f32.mrb[30].mxu0  ;;  %v2384_v26 = vsub.s32 3, %v4207_v44 }
0x11cd   : > { %v3576_v28 = vpop.f32.mrb[31].mxu0 }
0x11da   : > { %v2210_v29 = vpop.f32.mrb[32].mxu0 }
0x11db   : > { %v2216_v30 = vmul.f32 0.35355338, %v2210_v29  ;;  %v3583_v31 = vpop.f32.mrb[33].mxu0 }
0x11dc   : > { %v2213_v32 = vpop.f32.mrb[34].mxu0 }
0x11dd   : > { %v2218_v33 = vrot.slane %v2216_v30, 4  ;;  %v3584_v3 = vpop.f32.mrb[35].mxu0  ;;  %v2385_v30 = vrot.slane %v4211_v46, %v2384_v26 }
0x11de   : > { %v3753_v3 = vld [vmem:[%s4131_s23] sm:$0xff]  }
0x11df   : > { %v2220_v34 = vsel %vm1306_vm9, -1e+09, %v2218_v33 }
0x11e0   : > { %v2221_v40 = vsel %vm1830_vm14, %v2220_v34, -inf }
0x11e1   : > { %2222 = vmax.xlane.f32.xlu1 %v2221_v40  ;;  %v3755_v40 = vld [vmem:[%s4131_s23 + $0x10] sm:$0xff]  }
0x11f2   : > { %2237 = vrot.lane.b32.xlu1 %v4367_v38, %s3929_s12 }
0x11f6   : > { %1502 = vrot.lane.b32.xlu1 %v4285_v50, %s3930_s20 }
0x11fa   : > { %1628 = vrot.lane.b32.xlu1 %v4314_v16, %s3931_s3 }
0x11fe   : > { %1754 = vrot.lane.b32.xlu1 %v4349_v49, %s3932_s15 }
0x126e   : > { %v2223_v41 = vpop.xlane.xlu1 %2222 }
0x126f   : > { %v2224_v42 = vsub.f32 %v2220_v34, %v2223_v41  ;;  %v3754_v34 = vld [vmem:[%s4131_s23 + $0x8] sm:$0xff]   ;;  %v3756_v41 = vld [vmem:[%s4131_s23 + $0x18] sm:$0xff]  }
0x1271   : > { %v2225_v54 = vmul.f32 1.442695, %v2224_v42  ;;  %v3281_v42 = vld [vmem:[%s947_s29] ss:$0 sm:$0xff]  ;;  %s2359_s29 = sld [smem:[#allocation4 + %s2358_s1]] }
0x1272   : > { %v2238_v45 = vpop.permute.xlu1 %2237  ;;  %s4743_s1 = sld [smem:[#allocation21_spill]] (!%p3290_p3) }
0x1273   : > { %3785 = vpow2.f32 %v2225_v54  ;;  %v2244_v55 = vsel %vm1334_vm11, %v2238_v45, 0 }
0x1276   : > { %v1503_v47 = vpop.permute.xlu1 %1502 }
0x1277   : > { %1506 = vst.msk [vmem:[#allocation3] sm:$0xf] %vm1505_vm15, %v1503_v47 }
0x127a   : > { %v1629_v38 = vpop.permute.xlu1 %1628 }
0x127b   : > { %1632 = vst.msk [vmem:[#allocation3] sm:$0xf] %vm1631_vm0, %v1629_v38 }
0x127d   : > { %v3786_v50 = vpop.eup %3785 }
0x127e   : > { %v1755_v16 = vpop.permute.xlu1 %1754  ;;  %v2227_v51 = vsel %vm1830_vm14, %v3786_v50, 0.0 }
0x127f   : > { %1758 = vst.msk [vmem:[#allocation3] sm:$0xf] %vm1757_vm1, %v1755_v16  ;;  %2228 = vadd.xlane.f32.xlu0 %v2227_v51 }
0x1295   : > { %2235 = vrot.lane.b32.xlu0 %v4360_v6, %s3929_s12 }
0x1299   : > { %2027 = vrot.lane.b32.xlu0 %v4410_v60, %s3930_s20 }
0x129d   : > { %2157 = vrot.lane.b32.xlu0 %v2150_v25, %s3931_s3  ;;  %v2379_v25 = vsub.s32 2, %v4207_v44 }
0x129f   : > { %v2380_v27 = vrot.slane %v4211_v46, %v2379_v25 }
0x130c   : > { %v2229_v49 = vpop.xlane.xlu0 %2228 }
0x130d   : > { %3787 = vrcp.f32 %v2229_v49 }
0x1310   : > { %v2236_v53 = vpop.permute.xlu0 %2235 }
0x1311   : > { %3586 = vmatpush3.bf16.msra.mxu1 %v2236_v53 }
0x1312   : > { %3587 = vmatprep.subr.bf16.mxu1 %v3925_v35 }
0x1314   : > { %v2028_v56 = vpop.permute.xlu0 %2027 }
0x1315   : > { %2030 = vst.msk [vmem:[#allocation3 + $0x4] sm:$0xf] %vm1505_vm15, %v2028_v56  ;;  %3588 = vmatpush3.bf16.msra.mxu1 %v2244_v55 }
0x1316   : > { %3593 = vmatprep.subr.bf16.mxu1 %v3925_v35 }
0x1317   : > { %v3788_v6 = vpop.eup %3787 }
0x1318   : > { %v2231_v57 = vmul.f32 %v3788_v6, %v3786_v50  ;;  %v2158_v58 = vpop.permute.xlu0 %2157 }
0x1319   : > { %2160 = vst.msk [vmem:[#allocation3 + $0x4] sm:$0xf] %vm1631_vm0, %v2158_v58 }
0x131a   : > { %v2232_v59 = vpack.c.bf16 %v2231_v57, %v2231_v57 }
0x131c   : > { %v2234_v60 = vrot.slane %v2232_v59, 2  ;;  %v2474_v59 = vsub.s32 4, %v4207_v44 }
0x131e   : > { %3590 = vmatmul.mubr.msk.bf16.vlgmr.msra.gmra.mrb[28].mxu1 %vm1330_vm12, %v2234_v60  ;;  %v2475_v60 = vrot.slane %v4211_v46, %v2474_v59  ;;  %v3806_v59 = vld [vmem:[%s4742_s30 + $0x20] sm:$0xff] (!%p3290_p3)  }
0x131f   : > { %3597 = vmatprep.mubr.msk.bf16.mxu1 %vm3926_vm6, %v3925_v35  ;;  %3594 = vmatpush3.bf16.msra.mxu1 %v3749_v61 }
0x1320   : > { %3595 = vmatprep.subr.bf16.mxu1 %v3925_v35 }
0x1323   : > { %3596 = vmatpush3.bf16.msra.mxu1 %v3750_v52  ;;  %v2544_v52 = vstv %s2359_s29 }
0x1324   : > { %3609 = vmatprep.subr.bf16.mxu1 %v3925_v35 }
0x13f1   : > { %v2280_v62 = vpop.f32.mrb[28].mxu1 }
0x13f2   : > { %2287 = vrot.lane.b32.xlu0 %v2280_v62, %s3932_s15  ;;  %v3591_v63 = vpop.f32.mrb[29].mxu1 }
0x13f3   : > { %v2283_v0 = vpop.f32.mrb[30].mxu1 }
0x13f4   : > { %v3592_v1 = vpop.f32.mrb[31].mxu1 }
0x1464   : > { %v2288_v2 = vpop.permute.xlu0 %2287 }
0x1465   : > { %2290 = vst.msk [vmem:[#allocation3 + $0x4] sm:$0xf] %vm1757_vm1, %v2288_v2 }
0x146c   : > { %v2291_v5 = vld [vmem:[#allocation3] sm:$0xff] }
0x146d   : > { %v2292_v39 = vpack.c.bf16 %v2291_v5, %v2291_v5 }
0x146f   : > { %3598 = vmatmul.mubr.msk.bf16.vlgmr.msra.gmra.mrb[32].mxu1 %vm1195_vm8, %v2292_v39 }
0x1470   : > { %3617 = vmatprep.mubr.msk.bf16.mxu1 %vm3926_vm6, %v3925_v35  ;;  %3610 = vmatpush3.bf16.msra.mxu1 %v3753_v3  ;;  %vm3934_vm6 = vmmov (!%p3290_p3), 0  }
0x1471   : > { %3611 = vmatprep.subr.bf16.mxu1 %v3925_v35 }
0x1474   : > { %3612 = vmatpush3.bf16.msra.mxu1 %v3754_v34 }
0x1475   : > { %3613 = vmatprep.subr.bf16.mxu1 %v3925_v35 }
0x1478   : > { %3614 = vmatpush3.bf16.msra.mxu1 %v3755_v40  ;;  %v3933_v40 = vmov (!%p3290_p3), 0.0  }
0x1479   : > { %3615 = vmatprep.subr.bf16.mxu1 %v3925_v35  ;;  %3621 = vmatprep.subr.bf16.mxu0 (!%p3290_p3), %v3933_v40 }
0x147c   : > { %3616 = vmatpush3.bf16.msra.mxu1 %v3756_v41  ;;  %v3797_v41 = vld [vmem:[%s4741_s5 + $0x8] sm:$0xff] (!%p3290_p3)  }
0x147d   : > { %3629 = vmatprep.subr.bf16.mxu1 (!%p3290_p3), %v3933_v40 }
0x1542   : > { %v2350_v9 = vpop.f32.mrb[32].mxu1 }
0x1543   : > { %v2351_v11 = vadd.f32 %v2350_v9, %v2300_v8  ;;  %v3599_v12 = vpop.f32.mrb[33].mxu1 }
0x1544   : > { %v2353_v13 = vpop.f32.mrb[34].mxu1 }
0x1545   : > { %v2361_v14 = vmul.f32 %v2360_v10, %v2351_v11  ;;  %v3600_v36 = vpop.f32.mrb[35].mxu1 }
0x1546   : > { %v2567_v36 = vsub.s32 6, %v4207_v44 }
0x1547   : > { %v2362_v48 = vadd.f32 %v2361_v14, %v4183_v37  ;;  %v2562_v14 = vsub.s32 5, %v4207_v44  ;;  %v2571_v44 = vand.u32 127, %v1179_v43  ;;  %v3796_v43 = vld [vmem:[%s4741_s5] sm:$0xff] (!%p3290_p3)  }
0x1549   : > { %v2363_v15 = vsel %vm1195_vm8, %v2362_v48, 0.0  ;;  %vm2580_vm5 = vcmp.lt.s32.totalorder %v2571_v44, 8 }
0x154a   : > { %2364 = vadd.xlane.f32.xlu1 %v2363_v15 }
0x15d7   : > { %v2365_v17 = vpop.xlane.xlu1 %2364 }
0x15d8   : > { %v2367_v18 = vmul.f32 0.03125, %v2365_v17 }
0x15da   : > { %v2368_v19 = vsub.f32 %v2362_v48, %v2367_v18  ;;  %v3795_v48 = vld [vmem:[%s4136_s25] sm:$0x7f] }
0x15db   : > { %v2563_v15 = vrot.slane %v3795_v48, %v2562_v14  ;;  %v2568_v18 = vrot.slane %v3795_v48, %v2567_v36 }
0x15dc   : > { %v2369_v20 = vmul.f32 %v2368_v19, %v2368_v19 }
0x15de   : > { %v2370_v21 = vsel %vm1195_vm8, %v2369_v20, 0.0 }
0x15df   : > { %2371 = vadd.xlane.f32.xlu0 %v2370_v21 }
0x166c   : > { %v2372_v23 = vpop.xlane.xlu0 %2371 }
0x166d   : > { %v2373_v24 = vmul.f32 0.03125, %v2372_v23 }
0x166f   : > { %v2374_v37 = vadd.f32 1e-05, %v2373_v24 }
0x1671   : > { %3789 = vrsqrt.f32 %v2374_v37 }
0x167b   : > { %v3790_v28 = vpop.eup %3789 }
0x167c   : > { %v2376_v29 = vmul.f32 %v3790_v28, %v2368_v19 }
0x167e   : > { %v2381_v31 = vmul.f32 %v2380_v27, %v2376_v29 }
0x1680   : > { %v2386_v32 = vadd.f32 %v2385_v30, %v2381_v31 }
0x1682   : > { %v2387_v33 = vpack.c.bf16 %v2386_v32, %v2386_v32 }
0x1684   : > { %3606 = vmatmul.mubr.msk.bf16.vlgmr.msra.gmra.mrb[36].mxu0 %vm1195_vm8, %v2387_v33 }
0x1685   : > { %3622 = vmatpush3.bf16.msra.mxu0 (!%p3290_p3), %v3796_v43  ;;  %3625 = vmatprep.mubr.msk.bf16.mxu0 (!%p3290_p3), %vm3934_vm6, %v3933_v40 }
0x1686   : > { %3623 = vmatprep.subr.bf16.mxu0 (!%p3290_p3), %v3933_v40 }
0x1689   : > { %3624 = vmatpush3.bf16.msra.mxu0 (!%p3290_p3), %v3797_v41 }
0x168a   : > { %3649 = vmatprep.subr.bf16.mxu0 (!%p3290_p3), %v3933_v40 }
0x1757   : > { %v2448_v54 = vpop.f32.mrb[36].mxu0 }
0x1758   : > { %v2449_v45 = vadd.f32 %v3281_v42, %v2448_v54  ;;  %v3607_v47 = vpop.f32.mrb[37].mxu0  ;;  %v3798_v54 = vld [vmem:[%s4742_s30] sm:$0xff] (!%p3290_p3)  }
0x1759   : > { %v2451_v38 = vpop.f32.mrb[38].mxu0  ;;  %v2720_v47 = vsel (!%p3290_p3), %vm1195_vm8, %v3798_v54, 0 }
0x175a   : > { %v2454_v50 = vmul.f32 %v2449_v45, %v2449_v45  ;;  %v3608_v16 = vpop.f32.mrb[39].mxu0  ;;  %v3800_v38 = vld [vmem:[%s4742_s30 + $0x8] sm:$0xff] (!%p3290_p3)  }
0x175b   : > { %v2723_v16 = vsel (!%p3290_p3), %vm1195_vm8, %v3800_v38, 0 }
0x175c   : > { %v2455_v51 = vmul.f32 %v2454_v50, %v2449_v45  ;;  %v3799_v50 = vld [vmem:[%s4742_s30 + $0x40] sm:$0xff] (!%p3290_p3)  }
0x175e   : > { %v2456_v49 = vmul.f32 0.044715, %v2455_v51  ;;  %v2853_v51 = vsel (!%p3290_p3), %vm1195_vm8, %v3799_v50, 0 }
0x1760   : > { %v2457_v53 = vadd.f32 %v2456_v49, %v2449_v45  ;;  %v3802_v49 = vld [vmem:[%s4742_s30 + $0x10] sm:$0xff] (!%p3290_p3)  }
0x1762   : > { %v2458_v55 = vmul.f32 0.7978846, %v2457_v53  ;;  %v3801_v53 = vld [vmem:[%s4742_s30 + $0x48] sm:$0xff] (!%p3290_p3)  }
0x1764   : > { %3791 = vtanh.f32 %v2458_v55  ;;  %v2726_v55 = vsel (!%p3290_p3), %vm1195_vm8, %v3802_v49, 0 }
0x176e   : > { %v3792_v35 = vpop.eup %3791 }
0x176f   : > { %v2460_v56 = vadd.f32 1.0, %v3792_v35  ;;  %v2856_v35 = vsel (!%p3290_p3), %vm1195_vm8, %v3801_v53, 0 }
0x1771   : > { %v2461_v6 = vmul.f32 0.5, %v2460_v56  ;;  %v3804_v56 = vld [vmem:[%s4742_s30 + $0x18] sm:$0xff] (!%p3290_p3)  }
0x1773   : > { %v2462_v57 = vmul.f32 %v2461_v6, %v2449_v45  ;;  %v3803_v6 = vld [vmem:[%s4742_s30 + $0x50] sm:$0xff] (!%p3290_p3)  }
0x1775   : > { %v2463_v58 = vpack.c.bf16 %v2462_v57, %v2462_v57  ;;  %v2729_v57 = vsel (!%p3290_p3), %vm1195_vm8, %v3804_v56, 0 }
0x1777   : > { %3618 = vmatmul.mubr.msk.bf16.vlgmr.msra.gmra.mrb[36].mxu1 %vm2500_vm2, %v2463_v58  ;;  %v2859_v58 = vsel (!%p3290_p3), %vm1195_vm8, %v3803_v6, 0 }
0x1778   : > { %3645 = vmatprep.mubr.msk.bf16.mxu1 (!%p3290_p3), %vm3934_vm6, %v3933_v40  ;;  %3630 = vmatpush3.bf16.xpose.msra.mxu1 (!%p3290_p3), %v2720_v47 }
0x1779   : > { %3631 = vmatprep.subr.bf16.mxu1 (!%p3290_p3), %v3933_v40 }
0x1780   : > { %3632 = vmatpush3.bf16.xpose.msra.mxu1 (!%p3290_p3), %v2723_v16 }
0x1781   : > { %3633 = vmatprep.subr.bf16.mxu1 (!%p3290_p3), %v3933_v40 }
0x1788   : > { %3634 = vmatpush3.bf16.xpose.msra.mxu1 (!%p3290_p3), %v2726_v55 }
0x1789   : > { %3635 = vmatprep.subr.bf16.mxu1 (!%p3290_p3), %v3933_v40 }
0x1790   : > { %3636 = vmatpush3.bf16.xpose.msra.mxu1 (!%p3290_p3), %v2729_v57 }
0x1791   : > { %3637 = vmatprep.subr.bf16.mxu1 (!%p3290_p3), %v3933_v40 }
0x184a   : > { %v2538_v61 = vpop.f32.mrb[36].mxu1 }
0x184b   : > { %v2539_v62 = vadd.f32 %v2538_v61, %v2475_v60  ;;  %v3619_v63 = vpop.f32.mrb[37].mxu1  ;;  %v3805_v60 = vld [vmem:[%s4742_s30 + $0x58] sm:$0xff] (!%p3290_p3)   ;;  %v2732_v61 = vsel (!%p3290_p3), %vm1195_vm8, %v3806_v59, 0 }
0x184c   : > { %v2541_v0 = vpop.f32.mrb[38].mxu1  ;;  %3638 = vmatpush3.bf16.xpose.msra.mxu1 (!%p3290_p3), %v2732_v61  ;;  %v3807_v63 = vld [vmem:[%s4742_s30 + $0x60] sm:$0xff] (!%p3290_p3)  }
0x184d   : > { %v2545_v1 = vmul.f32 %v2544_v52, %v2539_v62  ;;  %v3620_v2 = vpop.f32.mrb[39].mxu1  ;;  %v2862_v52 = vsel (!%p3290_p3), %vm1195_vm8, %v3805_v60, 0  ;;  %3639 = vmatprep.subr.bf16.mxu1 (!%p3290_p3), %v3933_v40  ;;  %v3808_v62 = vld [vmem:[%s4742_s30 + $0x28] sm:$0xff] (!%p3290_p3)  }
0x184e   : > { %v2735_v0 = vsel (!%p3290_p3), %vm1195_vm8, %v3808_v62, 0  ;;  %v3810_v2 = vld [vmem:[%s4742_s30 + $0x30] sm:$0xff] (!%p3290_p3)  }
0x184f   : > { %v2546_v5 = vadd.f32 %v2545_v1, %v2386_v32  ;;  %v2865_v1 = vsel (!%p3290_p3), %vm1195_vm8, %v3807_v63, 0 }
0x1851   : > { %v2547_v39 = vsel %vm1195_vm8, %v2546_v5, 0.0 }
0x1852   : > { %2548 = vadd.xlane.f32.xlu0 %v2547_v39  ;;  %v2738_v39 = vsel (!%p3290_p3), %vm1195_vm8, %v3810_v2, 0 }
0x1854   : > { %3640 = vmatpush3.bf16.xpose.msra.mxu1 (!%p3290_p3), %v2735_v0 }
0x1855   : > { %3641 = vmatprep.subr.bf16.mxu1 (!%p3290_p3), %v3933_v40 }
0x185c   : > { %3642 = vmatpush3.bf16.xpose.msra.mxu1 (!%p3290_p3), %v2738_v39 }
0x185d   : > { %3643 = vmatprep.subr.bf16.mxu1 (!%p3290_p3), %v3933_v40 }
0x18df   : > { %v2549_v7 = vpop.xlane.xlu0 %2548 }
0x18e0   : > { %v2550_v8 = vmul.f32 0.03125, %v2549_v7 }
0x18e2   : > { %v2551_v9 = vsub.f32 %v2546_v5, %v2550_v8  ;;  %v3809_v5 = vld [vmem:[%s4742_s30 + $0x68] sm:$0xff] (!%p3290_p3)   ;;  %v3812_v8 = vld [vmem:[%s4742_s30 + $0x38] sm:$0xff] (!%p3290_p3)  }
0x18e3   : > { %v2868_v7 = vsel (!%p3290_p3), %vm1195_vm8, %v3809_v5, 0 }
0x18e4   : > { %v2552_v10 = vmul.f32 %v2551_v9, %v2551_v9 }
0x18e6   : > { %v2553_v11 = vsel %vm1195_vm8, %v2552_v10, 0.0  ;;  %v2741_v10 = vsel (!%p3290_p3), %vm1195_vm8, %v3812_v8, 0 }
0x18e7   : > { %2554 = vadd.xlane.f32.xlu1 %v2553_v11  ;;  %3644 = vmatpush3.bf16.xpose.msra.mxu1 (!%p3290_p3), %v2741_v10 }
0x1974   : > { %v2555_v46 = vpop.xlane.xlu1 %2554 }
0x1975   : > { %v2556_v12 = vmul.f32 0.03125, %v2555_v46  ;;  %v3813_v46 = vld [vmem:[%s4742_s30 + $0x78] sm:$0xff] (!%p3290_p3)  }
0x1977   : > { %v2557_v13 = vadd.f32 1e-05, %v2556_v12  ;;  %v2874_v12 = vsel (!%p3290_p3), %vm1195_vm8, %v3813_v46, 0 }
0x1979   : > { %3793 = vrsqrt.f32 %v2557_v13 }
0x1983   : > { %v3794_v17 = vpop.eup %3793 }
0x1984   : > { %v2559_v19 = vmul.f32 %v3794_v17, %v2551_v9  ;;  %v3811_v9 = vld [vmem:[%s4742_s30 + $0x70] sm:$0xff] (!%p3290_p3)  }
0x1985   : > { %v2871_v11 = vsel (!%p3290_p3), %vm1195_vm8, %v3811_v9, 0 }
0x1986   : > { %v2564_v20 = vmul.f32 %v2563_v15, %v2559_v19 }
0x1988   : > { %v2569_v21 = vadd.f32 %v2568_v18, %v2564_v20 }
0x198a   : > { %v2573_v22 = vsel %vm2572_vm3, %v2569_v21, -inf  ;;  %v2584_v4 = vsel %vm2583_vm4, %v2569_v21, -inf }
0x198b   : > { %v2574_v23 = vrot.slane %v2573_v22, 4  ;;  %v2585_v24 = vrot.slane %v2584_v4, 4 }
0x198d   : > { %v2575_v37 = vmax.f32 %v2573_v22, %v2574_v23  ;;  %v2586_v25 = vmax.f32 %v2584_v4, %v2585_v24 }
0x198f   : > { %v2576_v26 = vrot.slane %v2575_v37, 2  ;;  %v2587_v27 = vrot.slane %v2586_v25, 2 }
0x1991   : > { %v2577_v28 = vmax.f32 %v2575_v37, %v2576_v26  ;;  %v2588_v29 = vmax.f32 %v2586_v25, %v2587_v27  ;;  %v2786_v26 = vld [vmem:[%s4743_s1] sm:$0xf] (!%p3290_p3)  ;;  %v2919_v27 = vld [vmem:[%s4743_s1 + $0x4] sm:$0xf] (!%p3290_p3) }
0x1992   : > { %vm2787_vm7 = vcmp.gt.f32.partialorder (!%p3290_p3), %v2786_v26, 0.5 }
0x1993   : > { %v2578_v30 = vrot.slane %v2577_v28, 1  ;;  %v2589_v31 = vrot.slane %v2588_v29, 1  ;;  %2596 = sbr.rel (%p3290_p3) target bundleno = 7008 (0x1b60), region = 112 }
0x1995   : > { %v2579_v32 = vmax.f32 %v2577_v28, %v2578_v30  ;;  %v2590_v33 = vmax.f32 %v2588_v29, %v2589_v31 }
0x1997   : > { %v2581_v3 = vsel %vm2580_vm5, %v2579_v32, %v2569_v21  ;;  %v2591_v34 = vsel %vm2580_vm5, %v2590_v33, %v2569_v21 }
0x1998   : > { %2582 = vst.msk [vmem:[#allocation2] sm:$0xf] %vm2572_vm3, %v2581_v3 }
0x1999   : > { %2592 = vst.msk [vmem:[#allocation2] sm:$0xf0] %vm2583_vm4, %v2591_v34 }
0x19a0   : > { %v2597_v42 = vld [vmem:[#allocation2] sm:$0xff] }
0x19a1   : > { %2598 = vst.msk [vmem:[#allocation8] sm:$0xff] %vm1195_vm8, %v2597_v42  ;;  %v2599_v45 = vpack.c.bf16 %v2597_v42, %v2597_v42 }
0x19a3   : > { %3626 = vmatmul.mubr.msk.bf16.vlgmr.msra.gmra.mrb[0].mxu0 %vm1195_vm8, %v2599_v45 }
0x19a4   : > { %3665 = vmatprep.mubr.msk.bf16.mxu0 %vm3934_vm6, %v3933_v40  ;;  %3650 = vmatpush3.bf16.xpose.msra.mxu0 %v2853_v51 }
0x19a5   : > { %3651 = vmatprep.subr.bf16.mxu0 %v3933_v40 }
0x19ac   : > { %3652 = vmatpush3.bf16.xpose.msra.mxu0 %v2856_v35 }
0x19ad   : > { %3653 = vmatprep.subr.bf16.mxu0 %v3933_v40 }
0x19b4   : > { %3654 = vmatpush3.bf16.xpose.msra.mxu0 %v2859_v58 }
0x19b5   : > { %3655 = vmatprep.subr.bf16.mxu0 %v3933_v40 }
0x19bc   : > { %3656 = vmatpush3.bf16.xpose.msra.mxu0 %v2862_v52 }
0x19bd   : > { %3657 = vmatprep.subr.bf16.mxu0 %v3933_v40 }
0x19c4   : > { %3658 = vmatpush3.bf16.xpose.msra.mxu0 %v2865_v1 }
0x19c5   : > { %3659 = vmatprep.subr.bf16.mxu0 %v3933_v40 }
0x19cc   : > { %3660 = vmatpush3.bf16.xpose.msra.mxu0 %v2868_v7 }
0x19cd   : > { %3661 = vmatprep.subr.bf16.mxu0 %v3933_v40 }
0x19d4   : > { %3662 = vmatpush3.bf16.xpose.msra.mxu0 %v2871_v11 }
0x19d5   : > { %3663 = vmatprep.subr.bf16.mxu0 %v3933_v40 }
0x19dc   : > { %3664 = vmatpush3.bf16.xpose.msra.mxu0 %v2874_v12 }
0x1a76   : > { %v2653_v13 = vpop.f32.mrb[0].mxu0 }
0x1a77   : > { %v2659_v14 = vpack.c.bf16 %v2653_v13, %v2653_v13  ;;  %v3627_v36 = vpop.f32.mrb[1].mxu0 }
0x1a78   : > { %v2656_v48 = vpop.f32.mrb[2].mxu0 }
0x1a79   : > { %v2808_v15 = vrot.slane %v2659_v14, 2  ;;  %v3628_v17 = vpop.f32.mrb[3].mxu0  ;;  %3646 = vmatmul.mubr.msk.bf16.vlgmr.msra.gmra.mrb[0].mxu1 %vm1195_vm8, %v2659_v14 }
0x1a7b   : > { %3666 = vmatmul.mubr.msk.bf16.vlgmr.msra.gmra.mrb[4].mxu0 %vm1195_vm8, %v2808_v15  ;;  %vm2920_vm8 = vcmp.gt.f32.partialorder %v2919_v27, 0.5 }
0x1b4c   : > { %v2777_v18 = vpop.f32.mrb[0].mxu1 }
0x1b4d   : > { %v2783_v19 = vmul.f32 0.17677669, %v2777_v18  ;;  %v3647_v20 = vpop.f32.mrb[1].mxu1 }
0x1b4e   : > { %v2780_v21 = vpop.f32.mrb[2].mxu1  ;;  %v2910_v22 = vpop.f32.mrb[4].mxu0 }
0x1b4f   : > { %3814 = vtanh.f32 %v2783_v19  ;;  %v2916_v4 = vmul.f32 0.17677669, %v2910_v22  ;;  %v3648_v23 = vpop.f32.mrb[3].mxu1  ;;  %v3667_v24 = vpop.f32.mrb[5].mxu0 }
0x1b50   : > { %v2913_v37 = vpop.f32.mrb[6].mxu0 }
0x1b51   : > { %3816 = vtanh.f32 %v2916_v4  ;;  %v3668_v25 = vpop.f32.mrb[7].mxu0 }
0x1b59   : > { %v3815_v44 = vpop.eup %3814 }
0x1b5a   : > { %v2785_v28 = vmul.f32 10.0, %v3815_v44 }
0x1b5b   : > { %v3817_v29 = vpop.eup %3816 }
0x1b5c   : > { %v2788_v30 = vsel %vm2787_vm7, -inf, %v2785_v28  ;;  %v2918_v31 = vmul.f32 10.0, %v3817_v29 }
0x1b5d   : > { %2789 = vst [vmem:[#allocation7] sm:$0xf] %v2788_v30 }
0x1b5e   : > { %v2921_v32 = vsel %vm2920_vm8, -inf, %v2918_v31 }
0x1b5f   : > { %2922 = vst [vmem:[#allocation7 + $0x4] sm:$0xf] %v2921_v32 }
0x1b60 PF: > { %s4744_s25 = sld [smem:[#allocation14_spill]]  ;;  %s3935_s2 = smov [#allocation7]  }
0x1b61   : > { %s2932_s6 = sshll.u32 %s3935_s2, 4  ;;  %s3936_s26 = smov [#allocation8]   ;;  %s2933_s6 = int_to_ptr.vmem [resolvable:$true] %s2932_s6 }
0x1b62   : > { %s2945_s14 = sshll.u32 %s3936_s26, 4  ;;  %s3833_s24 = scalar_lea.vmem %s2933_s6, 128  ;;  %s4625_s14 = int_to_ptr.vmem [resolvable:$true] %s2945_s14 }
0x1b63   : > { %p3834_p5 = scmp.ne.s32.totalorder %s2933_s6, %s3833_s24  ;;  %p3840_p8 = scmp.lt.s32.totalorder %s2933_s6, %s2933_s6 }
0x1b64   : > { %p3841_p9 = scmp.lt.s32.totalorder %s3833_s24, %s3833_s24 }
0x1b66   : > { %s4745_s27 = sadd.s32 4294967295, %s4744_s25   ;;  %p3842_p10 = por %p3841_p9, %p3840_p8 }
0x1b67   : > { %p4621_p4 = scmp.eq.s32.totalorder %s4745_s27, 1 }
0x1b69   : > { %p3835_p6 = pnand %p3834_p5, %p4621_p4 }
0x1b6b   : > { %p3836_p7 = pneg %p3835_p6 }
0x1b6d   : > { %p3843_p11 = pnand %p3842_p10, %p3836_p7 }
0x1b6f   : > { %3846 = shalt.err (!%p3843_p11)
}
0x1b70   : > { %s4747_s20 = sld [smem:[#allocation27_spill]] }
0x1b76   : > { %s3847_s3 = scalar_lea.hbm %s4747_s20, 128 }
0x1b77   : > { %p3848_p12 = scmp.ne.s32.totalorder %s4747_s20, %s3847_s3  ;;  %p3853_p1 = scmp.lt.u32.totalorder %s3847_s3, %s4747_s20 }
0x1b79   : > { %p3849_p13 = pnand %p3848_p12, %p4621_p4 }
0x1b7b   : > { %p3850_p0 = pneg %p3849_p13 }
0x1b7d   : > { %p3855_p2 = pnand %p3853_p1, %p3850_p0 }
0x1b7f   : > { %3858 = shalt.err (!%p3855_p2)
}
0x1b80   : > { %3675 = dma.vmem_to_hbm [thread:$0]  (%p4621_p4), %s2933_s6, 128, %s4747_s20, [#allocation5]  }
0x1b81   : > { %s3859_s23 = scalar_lea.vmem %s4625_s14, 128  ;;  %p3866_p7 = scmp.lt.s32.totalorder %s4625_s14, %s4625_s14 }
0x1b82   : > { %p3860_p3 = scmp.ne.s32.totalorder %s4625_s14, %s3859_s23  ;;  %p3867_p8 = scmp.lt.s32.totalorder %s3859_s23, %s3859_s23 }
0x1b84   : > { %p3861_p5 = pnand %p3860_p3, %p4621_p4  ;;  %p3868_p9 = por %p3867_p8, %p3866_p7 }
0x1b86   : > { %p3862_p6 = pneg %p3861_p5 }
0x1b88   : > { %p3869_p10 = pnand %p3868_p9, %p3862_p6 }
0x1b8a   : > { %3872 = shalt.err (!%p3869_p10)
}
0x1b8b   : > { %s4748_s2 = sld [smem:[#allocation28_spill]] }
0x1b91   : > { %s4749_s24 = smov %s4748_s2  ;;  %s3873_s26 = scalar_lea.hbm %s4748_s2, 128 }
0x1b92   : > { %p3874_p11 = scmp.ne.s32.totalorder %s4749_s24, %s3873_s26  ;;  %p3879_p0 = scmp.lt.u32.totalorder %s3873_s26, %s4749_s24 }
0x1b94   : > { %p3875_p12 = pnand %p3874_p11, %p4621_p4 }
0x1b96   : > { %p3876_p13 = pneg %p3875_p12 }
0x1b98   : > { %p3881_p1 = pnand %p3879_p0, %p3876_p13 }
0x1b9a   : > { %3884 = shalt.err (!%p3881_p1)
}
0x1b9b   : > { %3677 = dma.vmem_to_hbm [thread:$0]  (%p4621_p4), %s4625_s14, 128, %s4749_s24, [#allocation9]  }
0x1b9c   : > { %3902 = dma.done.wait (%p4621_p4), [#allocation5], 128  }
0x1b9d   : > { %3904 = vsyncadd (%p4621_p4), [#allocation5], 4294967168 }
0x1b9e   : > { %3906 = dma.done.wait (%p4621_p4), [#allocation9], 128  }
0x1b9f   : > { %3908 = vsyncadd (%p4621_p4), [#allocation9], 4294967168 }
0x1ba0 PF: > { %s4750_s28 = sld [smem:[#allocation14_spill]]  ;;  %s4751_s2 = sld [smem:[#allocation13_spill]] }
0x1ba1   : > { %s4752_s25 = sld [smem:[#allocation15_spill]] }
0x1ba6   : > { %s35_s26 = sadd.s32 1, %s4750_s28  }
0x1ba7   : > { %p32_p2 = scmp.ge.s32.totalorder %s35_s26, 4  }
0x1ba9   :  { %34 = sbr.rel (!%p32_p2) target bundleno = 18 (0x12), region = 192 }
0x1bb0   :  { %2962 = vsyncpa [#allocation5], 1 }
0x1bb1   :  { %2964 = vsyncpa [#allocation5 + $0x1], 1 }
0x1bb2   :  { %2965 = vsyncpa [#allocation9], 1 }
0x1bb3   :  { %2966 = vsyncpa [#allocation6], 1 }
0x1bb4   :  { %2968 = vsyncpa [#allocation6 + $0x1], 1 }

</bundles_post_ra>
